<compile_context>
chip_gen: v5e
topology: v5e:2x2
jax: 0.10.0
libtpu: 0.0.40
codegen_flags: <defaults>
</compile_context>

<pallas_src>
import jax
import jax.numpy as jnp
from jax.experimental import pallas as pl
from jax.experimental.pallas import tpu as pltpu


def _round_up(x, m):
    return (x + m - 1) // m * m


# ---------------------------------------------------------------------------
# Kernel: 7 dense matmuls, no concat, lane-dense output.
# ---------------------------------------------------------------------------
def _attack_kernel(x_ref, w1_ref, w2_ref, w3e1_ref, wes_ref, b_ref, o_ref):
    # TODO(synk): nn.Dropout(p=0.2) is implemented as identity (eval-mode semantics).
    relu = lambda v: jnp.maximum(v, 0.0)
    dot = lambda a, w: jnp.dot(a, w, preferred_element_type=jnp.float32)

    x = x_ref[...]                                              # (Bp, 384)

    # Stage 1: block-diag first layers of all four components
    # (conv lowered to a (K*L, F*K) block).                      -> (Bp, 512)
    h = relu(dot(x, w1_ref[...]) + b_ref[:, 0:512])

    # Stage 2: block-diag second layers (grad branch Linear(80,128)). -> (Bp, 384)
    h = relu(dot(h, w2_ref[...]) + b_ref[:, 512:896])

    # Stage 3: identity for out/loss/label features, Linear(128,64) for grad.
    # Directly yields the concatenated feature vector [out|loss|grad|label].
    feats = relu(dot(h, w3e1_ref[0:384, :]) + b_ref[:, 896:1152])    # (Bp, 256)

    # Encoder 256 -> 256 -> 128 -> 64 -> 1 (last layer zero-padded to 128 lanes).
    h = relu(dot(feats, w3e1_ref[384:640, :]) + b_ref[:, 1152:1408])  # (Bp, 256)
    h = relu(dot(h, wes_ref[0:256, :]) + b_ref[:, 1408:1536])         # (Bp, 128)
    h = relu(dot(h, wes_ref[256:384, :]) + b_ref[:, 1536:1664])       # (Bp, 128), cols 64: = 0
    o_ref[...] = dot(h, wes_ref[384:512, :]) + b_ref[:, 1664:1792]    # (Bp, 128), col 0 real


# ---------------------------------------------------------------------------
# Raw (PyTorch-layout) parameters: Linear weights stored as (in, out).
# ---------------------------------------------------------------------------
def init_raw_params(key, class_num, kernel_size, layer_size, num_filters=10):
    def lin(k, fin, fout):
        k1, k2 = jax.random.split(k)
        w = jax.random.normal(k1, (fin, fout), jnp.float32) * 0.05
        b = jax.random.normal(k2, (fout,), jnp.float32) * 0.05
        return w, b

    keys = jax.random.split(key, 14)
    p = {}
    p['wo1'], p['bo1'] = lin(keys[0], class_num, 128)
    p['wo2'], p['bo2'] = lin(keys[1], 128, 64)
    p['wl1'], p['bl1'] = lin(keys[2], 1, 128)
    p['wl2'], p['bl2'] = lin(keys[3], 128, 64)
    kc1, kc2 = jax.random.split(keys[4])
    p['wc'] = jax.random.normal(kc1, (num_filters, layer_size), jnp.float32) * 0.05
    p['bc'] = jax.random.normal(kc2, (num_filters,), jnp.float32) * 0.05
    p['wg1'], p['bg1'] = lin(keys[5], num_filters * kernel_size, 128)
    p['wg2'], p['bg2'] = lin(keys[6], 128, 64)
    p['wb1'], p['bb1'] = lin(keys[7], class_num, 128)
    p['wb2'], p['bb2'] = lin(keys[8], 128, 64)
    p['we1'], p['be1'] = lin(keys[9], 256, 256)
    p['we2'], p['be2'] = lin(keys[10], 256, 128)
    p['we3'], p['be3'] = lin(keys[11], 128, 64)
    p['we4'], p['be4'] = lin(keys[12], 64, 1)
    return p


# ---------------------------------------------------------------------------
# Pack raw params into the block-diagonal / blob layout consumed by the kernel.
# ---------------------------------------------------------------------------
def pack_params(p, class_num, kernel_size, layer_size, num_filters=10):
    C, K, L, F = class_num, kernel_size, layer_size, num_filters
    KL, FK = K * L, F * K
    in_w = C + 1 + KL + C
    P0 = _round_up(in_w, 128)

    # Conv2d(1,F,[1,L]) + Flatten (NCHW channel-major index f*K + k) as matmul:
    #   wgc[k*L + l, f*K + k'] = wc[f, l] * delta(k, k')
    eye_k = jnp.eye(K, dtype=jnp.float32)
    wgc = jnp.einsum('fl,kK->klfK', p['wc'], eye_k).reshape(KL, FK)
    bgc = jnp.repeat(p['bc'], K)                                   # (FK,)

    # ---- Stage 1: block-diagonal (P0, 512) ----
    o_out, o_loss, o_grad, o_lab = 0, C, C + 1, C + 1 + KL
    w1 = jnp.zeros((P0, 512), jnp.float32)
    w1 = w1.at[o_out:o_out + C, 0:128].set(p['wo1'])
    w1 = w1.at[o_loss:o_loss + 1, 128:256].set(p['wl1'])
    w1 = w1.at[o_grad:o_grad + KL, 256:256 + FK].set(wgc)
    w1 = w1.at[o_lab:o_lab + C, 384:512].set(p['wb1'])
    b1 = jnp.zeros((512,), jnp.float32)
    b1 = b1.at[0:128].set(p['bo1']).at[128:256].set(p['bl1'])
    b1 = b1.at[256:256 + FK].set(bgc).at[384:512].set(p['bb1'])

    # ---- Stage 2: block-diagonal (512, 384) ----
    w2 = jnp.zeros((512, 384), jnp.float32)
    w2 = w2.at[0:128, 0:64].set(p['wo2'])
    w2 = w2.at[128:256, 64:128].set(p['wl2'])
    w2 = w2.at[256:256 + FK, 128:256].set(p['wg1'])
    w2 = w2.at[384:512, 256:320].set(p['wb2'])
    b2 = jnp.zeros((384,), jnp.float32)
    b2 = b2.at[0:64].set(p['bo2']).at[64:128].set(p['bl2'])
    b2 = b2.at[128:256].set(p['bg1']).at[256:320].set(p['bb2'])

    # ---- Stage 3: identity blocks + grad Linear(128,64) -> concatenated feats ----
    eye64 = jnp.eye(64, dtype=jnp.float32)
    w3 = jnp.zeros((384, 256), jnp.float32)
    w3 = w3.at[0:64, 0:64].set(eye64)           # out_feat passthrough
    w3 = w3.at[64:128, 64:128].set(eye64)       # loss_feat passthrough
    w3 = w3.at[128:256, 128:192].set(p['wg2'])  # grad 128 -> 64
    w3 = w3.at[256:320, 192:256].set(eye64)     # label_feat passthrough
    b3 = jnp.zeros((256,), jnp.float32).at[128:192].set(p['bg2'])

    # ---- Weight blobs ----
    w3e1 = jnp.concatenate([w3, p['we1']], axis=0)                       # (640, 256)
    we3p = jnp.zeros((128, 128), jnp.float32).at[:, 0:64].set(p['we3'])  # pad 64 -> 128 lanes
    we4p = jnp.zeros((128, 128), jnp.float32).at[0:64, 0:1].set(p['we4'])
    wes = jnp.concatenate([p['we2'], we3p, we4p], axis=0)                # (512, 128)

    be3p = jnp.zeros((128,), jnp.float32).at[0:64].set(p['be3'])
    be4p = jnp.zeros((128,), jnp.float32).at[0:1].set(p['be4'])
    biases = jnp.concatenate(
        [b1, b2, b3, p['be1'], p['be2'], be3p, be4p]).reshape(1, -1)     # (1, 1792)

    return dict(w1=w1, w2=w2, w3e1=w3e1, wes=wes, biases=biases, in_w=in_w, P0=P0)


# ---------------------------------------------------------------------------
# Wrapper
# ---------------------------------------------------------------------------
def whitebox_attack_binary(output, loss, gradient, label, packed):
    """output:(B,C) loss:(B,1) gradient:(B,1,K,L) [NCHW] label:(B,C) -> (B,1)"""
    B = output.shape[0]
    grad_flat = gradient.reshape(B, -1)
    x = jnp.concatenate(
        [output, loss, grad_flat, label], axis=1).astype(jnp.float32)    # (B, in_w)
    Bp = _round_up(B, 8)
    P0 = packed['w1'].shape[0]
    x = jnp.pad(x, ((0, Bp - B), (0, P0 - x.shape[1])))                  # (Bp, P0)

    vmem = pl.BlockSpec(memory_space=pltpu.MemorySpace.VMEM)
    args = (x, packed['w1'], packed['w2'], packed['w3e1'], packed['wes'],
            packed['biases'])
    out = pl.pallas_call(
        _attack_kernel,
        out_shape=jax.ShapeDtypeStruct((Bp, 128), jnp.float32),
        in_specs=[vmem] * len(args),
        out_specs=vmem,
    )(*args)
    return out[:B, :1]


# ---------------------------------------------------------------------------
# Pure-JAX reference of the ORIGINAL (unfused) module, eval-mode dropout.
# Independently implements the Conv2d so it also validates the matmul lowering.
# ---------------------------------------------------------------------------
def ref_forward(output, loss, gradient, label, p):
    r = lambda v: jnp.maximum(v, 0.0)
    of = r(r(output @ p['wo1'] + p['bo1']) @ p['wo2'] + p['bo2'])
    lf = r(r(loss @ p['wl1'] + p['bl1']) @ p['wl2'] + p['bl2'])
    B = gradient.shape[0]
    g = gradient[:, 0, :, :]                                             # (B, K, L)
    conv = jnp.einsum('bkl,fl->bfk', g, p['wc']) + p['bc'][None, :, None]
    conv = r(conv).reshape(B, -1)                                        # flatten f*K + k
    gf = r(r(conv @ p['wg1'] + p['bg1']) @ p['wg2'] + p['bg2'])
    bf = r(r(label @ p['wb1'] + p['bb1']) @ p['wb2'] + p['bb2'])
    f = jnp.concatenate([of, lf, gf, bf], axis=1)
    h = r(f @ p['we1'] + p['be1'])
    h = r(h @ p['we2'] + p['be2'])
    h = r(h @ p['we3'] + p['be3'])
    return h @ p['we4'] + p['be4']


if __name__ == "__main__":
    B, class_num, kernel_size, layer_size = 2, 10, 8, 32

    key = jax.random.PRNGKey(0)
    k_params, k_out, k_loss, k_grad, k_label = jax.random.split(key, 5)

    raw = init_raw_params(k_params, class_num, kernel_size, layer_size)
    packed = pack_params(raw, class_num, kernel_size, layer_size)

    output = jax.random.normal(k_out, (B, class_num), jnp.float32)
    loss = jax.random.normal(k_loss, (B, 1), jnp.float32)
    gradient = jax.random.normal(k_grad, (B, 1, kernel_size, layer_size), jnp.float32)
    label = jax.random.normal(k_label, (B, class_num), jnp.float32)

    result = whitebox_attack_binary(output, loss, gradient, label, packed)
    result = jax.block_until_ready(result)

    expected = jax.block_until_ready(ref_forward(output, loss, gradient, label, raw))
    assert result.shape == (B, 1), result.shape
    assert jnp.allclose(result, expected, atol=1e-2, rtol=1e-2), (result, expected)

    print("KERNEL_OK")
</pallas_src>

<mosaic_0001>
module attributes {stable_mosaic.version = 11 : i64} {
  func.func @_attack_kernel(%arg0: memref<8x384xf32, #tpu.memory_space<vmem>>, %arg1: memref<384x512xf32, #tpu.memory_space<vmem>>, %arg2: memref<512x384xf32, #tpu.memory_space<vmem>>, %arg3: memref<640x256xf32, #tpu.memory_space<vmem>>, %arg4: memref<512x128xf32, #tpu.memory_space<vmem>>, %arg5: memref<1x1792xf32, #tpu.memory_space<vmem>>, %arg6: memref<8x128xf32, #tpu.memory_space<vmem>>) attributes {dimension_semantics = [], scalar_prefetch = 0 : i64, scratch_operands = 0 : i64, tpu.core_type = #tpu.core_type<tc>} {
    %c0 = arith.constant 0 : index
    %c0_0 = arith.constant 0 : index
    %0 = vector.load %arg0[%c0, %c0_0] : memref<8x384xf32, #tpu.memory_space<vmem>>, vector<8x384xf32>
    %c0_1 = arith.constant 0 : index
    %c0_2 = arith.constant 0 : index
    %1 = vector.load %arg1[%c0_1, %c0_2] : memref<384x512xf32, #tpu.memory_space<vmem>>, vector<384x512xf32>
    %cst = arith.constant dense<0.000000e+00> : vector<8x512xf32>
    %2 = tpu.matmul %0, %1, %cst {dimension_numbers = #tpu.dot_dimension_numbers<[1], [0], [0], [1], [0, 0, 1, 1], [], []>} : vector<8x384xf32>, vector<384x512xf32>, vector<8x512xf32> -> vector<8x512xf32>
    %c0_3 = arith.constant 0 : index
    %c0_4 = arith.constant 0 : index
    %3 = vector.load %arg5[%c0_3, %c0_4] : memref<1x1792xf32, #tpu.memory_space<vmem>>, vector<1x512xf32>
    %4 = vector.broadcast %3 : vector<1x512xf32> to vector<8x512xf32>
    %5 = arith.addf %2, %4 : vector<8x512xf32>
    %cst_5 = arith.constant 0.000000e+00 : f32
    %6 = vector.broadcast %cst_5 : f32 to vector<8x512xf32>
    %7 = arith.maximumf %5, %6 : vector<8x512xf32>
    %c0_6 = arith.constant 0 : index
    %c0_7 = arith.constant 0 : index
    %8 = vector.load %arg2[%c0_6, %c0_7] : memref<512x384xf32, #tpu.memory_space<vmem>>, vector<512x384xf32>
    %cst_8 = arith.constant dense<0.000000e+00> : vector<8x384xf32>
    %9 = tpu.matmul %7, %8, %cst_8 {dimension_numbers = #tpu.dot_dimension_numbers<[1], [0], [0], [1], [0, 0, 1, 1], [], []>} : vector<8x512xf32>, vector<512x384xf32>, vector<8x384xf32> -> vector<8x384xf32>
    %c0_9 = arith.constant 0 : index
    %c512 = arith.constant 512 : index
    %10 = vector.load %arg5[%c0_9, %c512] : memref<1x1792xf32, #tpu.memory_space<vmem>>, vector<1x384xf32>
    %11 = vector.broadcast %10 : vector<1x384xf32> to vector<8x384xf32>
    %12 = arith.addf %9, %11 : vector<8x384xf32>
    %cst_10 = arith.constant 0.000000e+00 : f32
    %13 = vector.broadcast %cst_10 : f32 to vector<8x384xf32>
    %14 = arith.maximumf %12, %13 : vector<8x384xf32>
    %c0_11 = arith.constant 0 : index
    %c0_12 = arith.constant 0 : index
    %15 = vector.load %arg3[%c0_11, %c0_12] : memref<640x256xf32, #tpu.memory_space<vmem>>, vector<384x256xf32>
    %cst_13 = arith.constant dense<0.000000e+00> : vector<8x256xf32>
    %16 = tpu.matmul %14, %15, %cst_13 {dimension_numbers = #tpu.dot_dimension_numbers<[1], [0], [0], [1], [0, 0, 1, 1], [], []>} : vector<8x384xf32>, vector<384x256xf32>, vector<8x256xf32> -> vector<8x256xf32>
    %c0_14 = arith.constant 0 : index
    %c896 = arith.constant 896 : index
    %17 = vector.load %arg5[%c0_14, %c896] : memref<1x1792xf32, #tpu.memory_space<vmem>>, vector<1x256xf32>
    %18 = vector.broadcast %17 : vector<1x256xf32> to vector<8x256xf32>
    %19 = arith.addf %16, %18 : vector<8x256xf32>
    %cst_15 = arith.constant 0.000000e+00 : f32
    %20 = vector.broadcast %cst_15 : f32 to vector<8x256xf32>
    %21 = arith.maximumf %19, %20 : vector<8x256xf32>
    %c384 = arith.constant 384 : index
    %c0_16 = arith.constant 0 : index
    %22 = vector.load %arg3[%c384, %c0_16] : memref<640x256xf32, #tpu.memory_space<vmem>>, vector<256x256xf32>
    %cst_17 = arith.constant dense<0.000000e+00> : vector<8x256xf32>
    %23 = tpu.matmul %21, %22, %cst_17 {dimension_numbers = #tpu.dot_dimension_numbers<[1], [0], [0], [1], [0, 0, 1, 1], [], []>} : vector<8x256xf32>, vector<256x256xf32>, vector<8x256xf32> -> vector<8x256xf32>
    %c0_18 = arith.constant 0 : index
    %c1152 = arith.constant 1152 : index
    %24 = vector.load %arg5[%c0_18, %c1152] : memref<1x1792xf32, #tpu.memory_space<vmem>>, vector<1x256xf32>
    %25 = vector.broadcast %24 : vector<1x256xf32> to vector<8x256xf32>
    %26 = arith.addf %23, %25 : vector<8x256xf32>
    %cst_19 = arith.constant 0.000000e+00 : f32
    %27 = vector.broadcast %cst_19 : f32 to vector<8x256xf32>
    %28 = arith.maximumf %26, %27 : vector<8x256xf32>
    %c0_20 = arith.constant 0 : index
    %c0_21 = arith.constant 0 : index
    %29 = vector.load %arg4[%c0_20, %c0_21] : memref<512x128xf32, #tpu.memory_space<vmem>>, vector<256x128xf32>
    %cst_22 = arith.constant dense<0.000000e+00> : vector<8x128xf32>
    %30 = tpu.matmul %28, %29, %cst_22 {dimension_numbers = #tpu.dot_dimension_numbers<[1], [0], [0], [1], [0, 0, 1, 1], [], []>} : vector<8x256xf32>, vector<256x128xf32>, vector<8x128xf32> -> vector<8x128xf32>
    %c0_23 = arith.constant 0 : index
    %c1408 = arith.constant 1408 : index
    %31 = vector.load %arg5[%c0_23, %c1408] : memref<1x1792xf32, #tpu.memory_space<vmem>>, vector<1x128xf32>
    %32 = vector.broadcast %31 : vector<1x128xf32> to vector<8x128xf32>
    %33 = arith.addf %30, %32 : vector<8x128xf32>
    %cst_24 = arith.constant 0.000000e+00 : f32
    %34 = vector.broadcast %cst_24 : f32 to vector<8x128xf32>
    %35 = arith.maximumf %33, %34 : vector<8x128xf32>
    %c256 = arith.constant 256 : index
    %c0_25 = arith.constant 0 : index
    %36 = vector.load %arg4[%c256, %c0_25] : memref<512x128xf32, #tpu.memory_space<vmem>>, vector<128x128xf32>
    %cst_26 = arith.constant dense<0.000000e+00> : vector<8x128xf32>
    %37 = tpu.matmul %35, %36, %cst_26 {dimension_numbers = #tpu.dot_dimension_numbers<[1], [0], [0], [1], [0, 0, 1, 1], [], []>} : vector<8x128xf32>, vector<128x128xf32>, vector<8x128xf32> -> vector<8x128xf32>
    %c0_27 = arith.constant 0 : index
    %c1536 = arith.constant 1536 : index
    %38 = vector.load %arg5[%c0_27, %c1536] : memref<1x1792xf32, #tpu.memory_space<vmem>>, vector<1x128xf32>
    %39 = vector.broadcast %38 : vector<1x128xf32> to vector<8x128xf32>
    %40 = arith.addf %37, %39 : vector<8x128xf32>
    %cst_28 = arith.constant 0.000000e+00 : f32
    %41 = vector.broadcast %cst_28 : f32 to vector<8x128xf32>
    %42 = arith.maximumf %40, %41 : vector<8x128xf32>
    %c384_29 = arith.constant 384 : index
    %c0_30 = arith.constant 0 : index
    %43 = vector.load %arg4[%c384_29, %c0_30] : memref<512x128xf32, #tpu.memory_space<vmem>>, vector<128x128xf32>
    %cst_31 = arith.constant dense<0.000000e+00> : vector<8x128xf32>
    %44 = tpu.matmul %42, %43, %cst_31 {dimension_numbers = #tpu.dot_dimension_numbers<[1], [0], [0], [1], [0, 0, 1, 1], [], []>} : vector<8x128xf32>, vector<128x128xf32>, vector<8x128xf32> -> vector<8x128xf32>
    %c0_32 = arith.constant 0 : index
    %c1664 = arith.constant 1664 : index
    %45 = vector.load %arg5[%c0_32, %c1664] : memref<1x1792xf32, #tpu.memory_space<vmem>>, vector<1x128xf32>
    %46 = vector.broadcast %45 : vector<1x128xf32> to vector<8x128xf32>
    %47 = arith.addf %44, %46 : vector<8x128xf32>
    %c0_33 = arith.constant 0 : index
    %c0_34 = arith.constant 0 : index
    %48 = vector.load %arg6[%c0_33, %c0_34] : memref<8x128xf32, #tpu.memory_space<vmem>>, vector<8x128xf32>
    tpu.vector_store %arg6[%c0_33, %c0_34], %47 {strides = array<i32>} : memref<8x128xf32, #tpu.memory_space<vmem>>, vector<8x128xf32>,
    return
  }
}

</mosaic_0001>

<bundles_post_ra>
// kernel: tpu_custom_call.1
= control target key start
LH: loop header
LB: loop body
LE: loop exit
PB: predicated region body
PF: predicated region fallthrough
CT: control target
= control target key end

     0   :  { %11 = vsyncpa [#allocation3], 0  ;;  %s1872_s0 = inlined_call_operand.hbm [shape: f32[8,384], index: 0, kind: input, shape index: {}]   ;;  %s1873_s1 = inlined_call_operand.hbm [shape: f32[384,512], index: 1, kind: input, shape index: {}]   ;;  %s1874_s2 = inlined_call_operand.hbm [shape: f32[512,384], index: 2, kind: input, shape index: {}]   ;;  %s1875_s3 = inlined_call_operand.hbm [shape: f32[640,256], index: 3, kind: input, shape index: {}]   ;;  %s1876_s4 = inlined_call_operand.hbm [shape: f32[512,128], index: 4, kind: input, shape index: {}]   ;;  %s1877_s5 = inlined_call_operand.hbm [shape: f32[1,1792], index: 5, kind: input, shape index: {}]   ;;  %s1878_s6 = inlined_call_operand.hbm [shape: f32[8,128], index: 6, kind: output, shape index: {}]  }
   0x1   :  { %12 = vsyncpa [#allocation6], 0 }
   0x2   :  { %13 = vsyncpa [#allocation9], 0 }
   0x3   :  { %14 = vsyncpa [#allocation12], 0  ;;  %s31_s23 = sshll.u32 %s1873_s1, 4  ;;  %s32_s23 = int_to_ptr.hbm [resolvable:$true] %s31_s23 }
   0x4   :  { %15 = vsyncpa [#allocation4], 0  ;;  %s1757_s24 = smov [#allocation5]   ;;  %s57_s28 = sshll.u32 %s1875_s3, 4  ;;  %s58_s28 = int_to_ptr.hbm [resolvable:$true] %s57_s28 }
   0x5   :  { %s33_s25 = sshll.u32 %s1757_s24, 4  ;;  %s1758_s29 = smov 512   ;;  %s34_s25 = int_to_ptr.vmem [resolvable:$true] %s33_s25 }
   0x6   :  { %s1759_s30 = smov 32   ;;  %s1760_s7 = smov [#allocation8]  }
   0x7   :  { %39 = dma.hbm_to_vmem [thread:$0]  %s32_s23, 24576, %s34_s25, [#allocation6], %s1758_s29, %s1758_s29, %s1759_s30  }
   0x8   :  { %s59_s8 = sshll.u32 %s1760_s7, 4  ;;  %s1761_s9 = smov 256   ;;  %s60_s8 = int_to_ptr.vmem [resolvable:$true] %s59_s8 }
   0x9   :  { %s1762_s10 = smov 16   ;;  %s21_s12 = sshll.u32 %s1872_s0, 4  ;;  %s22_s12 = int_to_ptr.hbm [resolvable:$true] %s21_s12 }
   0xa   :  { %65 = dma.hbm_to_vmem [thread:$0]  %s58_s28, 20480, %s60_s8, [#allocation9], %s1761_s9, %s1761_s9, %s1762_s10  }
   0xb   :  { %s1763_s13 = smov [#allocation2]   ;;  %s44_s16 = sshll.u32 %s1874_s2, 4  ;;  %s45_s16 = int_to_ptr.hbm [resolvable:$true] %s44_s16 }
   0xc   :  { %s23_s14 = sshll.u32 %s1763_s13, 4  ;;  %s1764_s17 = smov [#allocation7]   ;;  %s24_s14 = int_to_ptr.vmem [resolvable:$true] %s23_s14 }
   0xd   :  { %26 = dma.hbm_to_vmem [thread:$0]  %s22_s12, 384, %s24_s14, [#allocation3]  }
   0xe   :  { %s46_s18 = sshll.u32 %s1764_s17, 4  ;;  %s1765_s19 = smov 384   ;;  %s47_s18 = int_to_ptr.vmem [resolvable:$true] %s46_s18 }
   0xf   :  { %s1766_s20 = smov 24   ;;  %s70_s0 = sshll.u32 %s1876_s4, 4  ;;  %s71_s0 = int_to_ptr.hbm [resolvable:$true] %s70_s0 }
  0x10   :  { %52 = dma.hbm_to_vmem [thread:$0]  %s45_s16, 24576, %s47_s18, [#allocation6], %s1765_s19, %s1765_s19, %s1766_s20  }
  0x11   :  { %s1767_s23 = smov [#allocation10]   ;;  %s84_s2 = sshll.u32 %s1877_s5, 4  ;;  %s85_s2 = int_to_ptr.hbm [resolvable:$true] %s84_s2 }
  0x12   :  { %s72_s24 = sshll.u32 %s1767_s23, 4  ;;  %s1768_s27 = smov 128   ;;  %s73_s24 = int_to_ptr.vmem [resolvable:$true] %s72_s24 }
  0x13   :  { %s1769_s28 = smov 8   ;;  %s1770_s29 = smov [#allocation11]  }
  0x14   :  { %78 = dma.hbm_to_vmem [thread:$0]  %s71_s0, 8192, %s73_s24, [#allocation9], %s1768_s27, %s1768_s27, %s1769_s28  }
  0x15   :  { %s86_s30 = sshll.u32 %s1770_s29, 4  ;;  %s87_s30 = int_to_ptr.vmem [resolvable:$true] %s86_s30 }
  0x16   :  { %89 = dma.hbm_to_vmem [thread:$0]  %s85_s2, 224, %s87_s30, [#allocation12]  }
  0x17   :  { %1747 = dma.done.wait [#allocation3], 384  }
  0x18   :  { %1748 = vsyncadd [#allocation3], 4294966912 }
  0x19   :  { %1749 = dma.done.wait [#allocation6], 49152  }
  0x1a   :  { %1750 = vsyncadd [#allocation6], 4294918144 }
  0x1b   :  { %1751 = dma.done.wait [#allocation9], 28672  }
  0x1c   :  { %1752 = vsyncadd [#allocation9], 4294938624 }
  0x1d   :  { %1753 = dma.done.wait [#allocation12], 224  }
  0x1e   :  { %1754 = vsyncadd [#allocation12], 4294967072  ;;  %v177_v0 = vld [vmem:[#allocation5 + $0x1e0] sm:$0xff]  ;;  %v178_v5 = vld [vmem:[#allocation5 + $0x1e8] sm:$0xff]  ;;  %s1771_s4 = smov [#allocation13]   ;;  %s1548_s9 = sshll.u32 %s1878_s6, 4  ;;  %s1549_s9 = int_to_ptr.hbm [resolvable:$true] %s1548_s9 }
  0x1f   :  { %v305_v1 = vld [vmem:[#allocation5 + $0x5e0] sm:$0xff]  ;;  %319 = vmatpush.msra.mxu0 %v177_v0  ;;  %379 = vmatpush.msra.mxu3 %v178_v5  ;;  %v174_v9 = vld [vmem:[#allocation5 + $0x1c8] sm:$0xff]  ;;  %v1825_v62 = vld [vmem:[#allocation2 + $0x10] sm:$0xff]  ;;  %s1546_s5 = sshll.u32 %s1771_s4, 4  ;;  %s1547_s5 = int_to_ptr.vmem [resolvable:$true] %s1546_s5 }
  0x20   :  { %v173_v2 = vld [vmem:[#allocation5 + $0x1c0] sm:$0xff]  ;;  %359 = vmatpush.msra.mxu2 %v305_v1  ;;  %v170_v13 = vld [vmem:[#allocation5 + $0x1a8] sm:$0xff]  ;;  %v179_v0 = vld [vmem:[#allocation5 + $0x1f0] sm:$0xff] }
  0x21   :  { %v241_v3 = vld [vmem:[#allocation5 + $0x3e0] sm:$0xff]  ;;  %320 = vmatpush.msra.mxu0 %v173_v2  ;;  %380 = vmatpush.msra.mxu3 %v174_v9  ;;  %v166_v15 = vld [vmem:[#allocation5 + $0x188] sm:$0xff] }
  0x22   :  { %v301_v4 = vld [vmem:[#allocation5 + $0x5c0] sm:$0xff]  ;;  %339 = vmatpush.msra.mxu1 %v241_v3  ;;  %v162_v19 = vld [vmem:[#allocation5 + $0x168] sm:$0xff] }
  0x23   :  { %v169_v6 = vld [vmem:[#allocation5 + $0x1a0] sm:$0xff]  ;;  %360 = vmatpush.msra.mxu2 %v301_v4  ;;  %381 = vmatpush.msra.mxu3 %v170_v13  ;;  %v158_v23 = vld [vmem:[#allocation5 + $0x148] sm:$0xff] }
  0x24   :  { %v237_v7 = vld [vmem:[#allocation5 + $0x3c0] sm:$0xff]  ;;  %321 = vmatpush.msra.mxu0 %v169_v6  ;;  %v154_v27 = vld [vmem:[#allocation5 + $0x128] sm:$0xff]  ;;  %v175_v6 = vld [vmem:[#allocation5 + $0x1d0] sm:$0xff] }
  0x25   :  { %v297_v8 = vld [vmem:[#allocation5 + $0x5a0] sm:$0xff]  ;;  %340 = vmatpush.msra.mxu1 %v237_v7  ;;  %382 = vmatpush.msra.mxu3 %v166_v15  ;;  %v150_v31 = vld [vmem:[#allocation5 + $0x108] sm:$0xff]  ;;  %v243_v7 = vld [vmem:[#allocation5 + $0x3f0] sm:$0xff] }
  0x26   :  { %v233_v10 = vld [vmem:[#allocation5 + $0x3a0] sm:$0xff]  ;;  %361 = vmatpush.msra.mxu2 %v297_v8  ;;  %v146_v35 = vld [vmem:[#allocation5 + $0xe8] sm:$0xff]  ;;  %v1831_v8 = vld [vmem:[#allocation2 + $0x8] sm:$0xff] }
  0x27   :  { %v165_v11 = vld [vmem:[#allocation5 + $0x180] sm:$0xff]  ;;  %341 = vmatpush.msra.mxu1 %v233_v10  ;;  %383 = vmatpush.msra.mxu3 %v162_v19  ;;  %v142_v39 = vld [vmem:[#allocation5 + $0xc8] sm:$0xff]  ;;  %v167_v15 = vld [vmem:[#allocation5 + $0x190] sm:$0xff] }
  0x28   :  { %v293_v12 = vld [vmem:[#allocation5 + $0x580] sm:$0xff]  ;;  %322 = vmatpush.msra.mxu0 %v165_v11  ;;  %v138_v43 = vld [vmem:[#allocation5 + $0xa8] sm:$0xff]  ;;  %v171_v11 = vld [vmem:[#allocation5 + $0x1b0] sm:$0xff] }
  0x29   :  { %v229_v14 = vld [vmem:[#allocation5 + $0x380] sm:$0xff]  ;;  %362 = vmatpush.msra.mxu2 %v293_v12  ;;  %384 = vmatpush.msra.mxu3 %v158_v23  ;;  %v134_v47 = vld [vmem:[#allocation5 + $0x88] sm:$0xff]  ;;  %v239_v12 = vld [vmem:[#allocation5 + $0x3d0] sm:$0xff] }
  0x2a   :  { %v161_v16 = vld [vmem:[#allocation5 + $0x160] sm:$0xff]  ;;  %342 = vmatpush.msra.mxu1 %v229_v14  ;;  %v130_v51 = vld [vmem:[#allocation5 + $0x68] sm:$0xff]  ;;  %v163_v19 = vld [vmem:[#allocation5 + $0x170] sm:$0xff] }
  0x2b   :  { %v289_v17 = vld [vmem:[#allocation5 + $0x560] sm:$0xff]  ;;  %323 = vmatpush.msra.mxu0 %v161_v16  ;;  %385 = vmatpush.msra.mxu3 %v154_v27  ;;  %v126_v55 = vld [vmem:[#allocation5 + $0x48] sm:$0xff]  ;;  %v235_v16 = vld [vmem:[#allocation5 + $0x3b0] sm:$0xff] }
  0x2c   :  { %v225_v18 = vld [vmem:[#allocation5 + $0x360] sm:$0xff]  ;;  %363 = vmatpush.msra.mxu2 %v289_v17  ;;  %v122_v59 = vld [vmem:[#allocation5 + $0x28] sm:$0xff]  ;;  %v159_v23 = vld [vmem:[#allocation5 + $0x150] sm:$0xff] }
  0x2d   :  { %v157_v20 = vld [vmem:[#allocation5 + $0x140] sm:$0xff]  ;;  %343 = vmatpush.msra.mxu1 %v225_v18  ;;  %386 = vmatpush.msra.mxu3 %v150_v31  ;;  %v242_v63 = vld [vmem:[#allocation5 + $0x3e8] sm:$0xff]  ;;  %v155_v27 = vld [vmem:[#allocation5 + $0x130] sm:$0xff] }
  0x2e   :  { %v285_v21 = vld [vmem:[#allocation5 + $0x540] sm:$0xff]  ;;  %324 = vmatpush.msra.mxu0 %v157_v20  ;;  %v118_v2 = vld [vmem:[#allocation5 + $0x8] sm:$0xff]  ;;  %v231_v20 = vld [vmem:[#allocation5 + $0x390] sm:$0xff] }
  0x2f   :  { %v221_v22 = vld [vmem:[#allocation5 + $0x340] sm:$0xff]  ;;  %364 = vmatpush.msra.mxu2 %v285_v21  ;;  %387 = vmatpush.msra.mxu3 %v146_v35  ;;  %v1827_v3 = vld [vmem:[#allocation2] sm:$0xff]  ;;  %v151_v31 = vld [vmem:[#allocation5 + $0x110] sm:$0xff] }
  0x30   :  { %v153_v24 = vld [vmem:[#allocation5 + $0x120] sm:$0xff]  ;;  %344 = vmatpush.msra.mxu1 %v221_v22  ;;  %v238_v4 = vld [vmem:[#allocation5 + $0x3c8] sm:$0xff]  ;;  %v147_v35 = vld [vmem:[#allocation5 + $0xf0] sm:$0xff] }
  0x31   :  { %v281_v25 = vld [vmem:[#allocation5 + $0x520] sm:$0xff]  ;;  %325 = vmatpush.msra.mxu0 %v153_v24  ;;  %388 = vmatpush.msra.mxu3 %v142_v39  ;;  %v306_v5 = vld [vmem:[#allocation5 + $0x5e8] sm:$0xff]  ;;  %v227_v24 = vld [vmem:[#allocation5 + $0x370] sm:$0xff] }
  0x32   :  { %v217_v26 = vld [vmem:[#allocation5 + $0x320] sm:$0xff]  ;;  %365 = vmatpush.msra.mxu2 %v281_v25  ;;  %v234_v9 = vld [vmem:[#allocation5 + $0x3a8] sm:$0xff]  ;;  %v143_v39 = vld [vmem:[#allocation5 + $0xd0] sm:$0xff] }
  0x33   :  { %v149_v28 = vld [vmem:[#allocation5 + $0x100] sm:$0xff]  ;;  %345 = vmatpush.msra.mxu1 %v217_v26  ;;  %389 = vmatpush.msra.mxu3 %v138_v43  ;;  %v302_v10 = vld [vmem:[#allocation5 + $0x5c8] sm:$0xff]  ;;  %v139_v43 = vld [vmem:[#allocation5 + $0xb0] sm:$0xff] }
  0x34   :  { %v277_v29 = vld [vmem:[#allocation5 + $0x500] sm:$0xff]  ;;  %326 = vmatpush.msra.mxu0 %v149_v28  ;;  %v230_v13 = vld [vmem:[#allocation5 + $0x388] sm:$0xff]  ;;  %v223_v28 = vld [vmem:[#allocation5 + $0x350] sm:$0xff] }
  0x35   :  { %v213_v30 = vld [vmem:[#allocation5 + $0x300] sm:$0xff]  ;;  %366 = vmatpush.msra.mxu2 %v277_v29  ;;  %390 = vmatpush.msra.mxu3 %v134_v47  ;;  %v298_v14 = vld [vmem:[#allocation5 + $0x5a8] sm:$0xff]  ;;  %v135_v47 = vld [vmem:[#allocation5 + $0x90] sm:$0xff] }
  0x36   :  { %v145_v32 = vld [vmem:[#allocation5 + $0xe0] sm:$0xff]  ;;  %346 = vmatpush.msra.mxu1 %v213_v30  ;;  %v226_v17 = vld [vmem:[#allocation5 + $0x368] sm:$0xff] }
  0x37   :  { %v273_v33 = vld [vmem:[#allocation5 + $0x4e0] sm:$0xff]  ;;  %327 = vmatpush.msra.mxu0 %v145_v32  ;;  %391 = vmatpush.msra.mxu3 %v130_v51  ;;  %v294_v18 = vld [vmem:[#allocation5 + $0x588] sm:$0xff]  ;;  %v219_v32 = vld [vmem:[#allocation5 + $0x330] sm:$0xff] }
  0x38   :  { %v209_v34 = vld [vmem:[#allocation5 + $0x2e0] sm:$0xff]  ;;  %367 = vmatpush.msra.mxu2 %v273_v33  ;;  %v222_v21 = vld [vmem:[#allocation5 + $0x348] sm:$0xff]  ;;  %v131_v51 = vld [vmem:[#allocation5 + $0x70] sm:$0xff] }
  0x39   :  { %v141_v36 = vld [vmem:[#allocation5 + $0xc0] sm:$0xff]  ;;  %347 = vmatpush.msra.mxu1 %v209_v34  ;;  %392 = vmatpush.msra.mxu3 %v126_v55  ;;  %v290_v22 = vld [vmem:[#allocation5 + $0x568] sm:$0xff]  ;;  %v127_v55 = vld [vmem:[#allocation5 + $0x50] sm:$0xff] }
  0x3a   :  { %v269_v37 = vld [vmem:[#allocation5 + $0x4c0] sm:$0xff]  ;;  %328 = vmatpush.msra.mxu0 %v141_v36  ;;  %v218_v25 = vld [vmem:[#allocation5 + $0x328] sm:$0xff]  ;;  %v215_v36 = vld [vmem:[#allocation5 + $0x310] sm:$0xff] }
  0x3b   :  { %v205_v38 = vld [vmem:[#allocation5 + $0x2c0] sm:$0xff]  ;;  %368 = vmatpush.msra.mxu2 %v269_v37  ;;  %393 = vmatpush.msra.mxu3 %v122_v59  ;;  %v286_v26 = vld [vmem:[#allocation5 + $0x548] sm:$0xff]  ;;  %v123_v59 = vld [vmem:[#allocation5 + $0x30] sm:$0xff] }
  0x3c   :  { %v137_v40 = vld [vmem:[#allocation5 + $0xa0] sm:$0xff]  ;;  %348 = vmatpush.msra.mxu1 %v205_v38  ;;  %v214_v29 = vld [vmem:[#allocation5 + $0x308] sm:$0xff] }
  0x3d   :  { %v265_v41 = vld [vmem:[#allocation5 + $0x4a0] sm:$0xff]  ;;  %329 = vmatpush.msra.mxu0 %v137_v40  ;;  %394 = vmatpush.msra.mxu3 %v118_v2  ;;  %v282_v30 = vld [vmem:[#allocation5 + $0x528] sm:$0xff]  ;;  %v211_v40 = vld [vmem:[#allocation5 + $0x2f0] sm:$0xff] }
  0x3e   :  { %v201_v42 = vld [vmem:[#allocation5 + $0x2a0] sm:$0xff]  ;;  %369 = vmatpush.msra.mxu2 %v265_v41  ;;  %v210_v33 = vld [vmem:[#allocation5 + $0x2e8] sm:$0xff]  ;;  %395 = vmatmul.f32.vlgmr.msra.gmra.mxu3 %v1827_v3  ;;  %v244_v2 = vld [vmem:[#allocation5 + $0x3f8] sm:$0xff] }
  0x3f   :  { %v133_v44 = vld [vmem:[#allocation5 + $0x80] sm:$0xff]  ;;  %349 = vmatpush.msra.mxu1 %v201_v42  ;;  %459 = vmatpush.msrb.mxu3 %v243_v7  ;;  %v278_v34 = vld [vmem:[#allocation5 + $0x508] sm:$0xff]  ;;  %v303_v7 = vld [vmem:[#allocation5 + $0x5d0] sm:$0xff] }
  0x40   :  { %v261_v45 = vld [vmem:[#allocation5 + $0x480] sm:$0xff]  ;;  %330 = vmatpush.msra.mxu0 %v133_v44  ;;  %v206_v37 = vld [vmem:[#allocation5 + $0x2c8] sm:$0xff]  ;;  %v207_v44 = vld [vmem:[#allocation5 + $0x2d0] sm:$0xff] }
  0x41   :  { %v197_v46 = vld [vmem:[#allocation5 + $0x280] sm:$0xff]  ;;  %370 = vmatpush.msra.mxu2 %v261_v45  ;;  %460 = vmatpush.msrb.mxu3 %v239_v12  ;;  %v274_v38 = vld [vmem:[#allocation5 + $0x4e8] sm:$0xff]  ;;  %v299_v12 = vld [vmem:[#allocation5 + $0x5b0] sm:$0xff] }
  0x42   :  { %v129_v48 = vld [vmem:[#allocation5 + $0x60] sm:$0xff]  ;;  %350 = vmatpush.msra.mxu1 %v197_v46  ;;  %v202_v41 = vld [vmem:[#allocation5 + $0x2a8] sm:$0xff] }
  0x43   :  { %v257_v49 = vld [vmem:[#allocation5 + $0x460] sm:$0xff]  ;;  %331 = vmatpush.msra.mxu0 %v129_v48  ;;  %461 = vmatpush.msrb.mxu3 %v235_v16  ;;  %v270_v42 = vld [vmem:[#allocation5 + $0x4c8] sm:$0xff]  ;;  %v203_v48 = vld [vmem:[#allocation5 + $0x2b0] sm:$0xff] }
  0x44   :  { %v193_v50 = vld [vmem:[#allocation5 + $0x260] sm:$0xff]  ;;  %371 = vmatpush.msra.mxu2 %v257_v49  ;;  %v198_v45 = vld [vmem:[#allocation5 + $0x288] sm:$0xff]  ;;  %v295_v16 = vld [vmem:[#allocation5 + $0x590] sm:$0xff] }
  0x45   :  { %v125_v52 = vld [vmem:[#allocation5 + $0x40] sm:$0xff]  ;;  %351 = vmatpush.msra.mxu1 %v193_v50  ;;  %462 = vmatpush.msrb.mxu3 %v231_v20  ;;  %v266_v46 = vld [vmem:[#allocation5 + $0x4a8] sm:$0xff]  ;;  %v291_v20 = vld [vmem:[#allocation5 + $0x570] sm:$0xff] }
  0x46   :  { %v253_v53 = vld [vmem:[#allocation5 + $0x440] sm:$0xff]  ;;  %332 = vmatpush.msra.mxu0 %v125_v52  ;;  %v194_v49 = vld [vmem:[#allocation5 + $0x268] sm:$0xff]  ;;  %v199_v52 = vld [vmem:[#allocation5 + $0x290] sm:$0xff] }
  0x47   :  { %v189_v54 = vld [vmem:[#allocation5 + $0x240] sm:$0xff]  ;;  %372 = vmatpush.msra.mxu2 %v253_v53  ;;  %463 = vmatpush.msrb.mxu3 %v227_v24  ;;  %v262_v50 = vld [vmem:[#allocation5 + $0x488] sm:$0xff]  ;;  %v287_v24 = vld [vmem:[#allocation5 + $0x550] sm:$0xff] }
  0x48   :  { %v121_v56 = vld [vmem:[#allocation5 + $0x20] sm:$0xff]  ;;  %352 = vmatpush.msra.mxu1 %v189_v54  ;;  %v190_v53 = vld [vmem:[#allocation5 + $0x248] sm:$0xff] }
  0x49   :  { %v249_v57 = vld [vmem:[#allocation5 + $0x420] sm:$0xff]  ;;  %333 = vmatpush.msra.mxu0 %v121_v56  ;;  %464 = vmatpush.msrb.mxu3 %v223_v28  ;;  %v258_v54 = vld [vmem:[#allocation5 + $0x468] sm:$0xff]  ;;  %v195_v56 = vld [vmem:[#allocation5 + $0x270] sm:$0xff] }
  0x4a   :  { %v185_v58 = vld [vmem:[#allocation5 + $0x220] sm:$0xff]  ;;  %373 = vmatpush.msra.mxu2 %v249_v57  ;;  %v186_v57 = vld [vmem:[#allocation5 + $0x228] sm:$0xff]  ;;  %v283_v28 = vld [vmem:[#allocation5 + $0x530] sm:$0xff] }
  0x4b   :  { %v117_v60 = vld [vmem:[#allocation5] sm:$0xff]  ;;  %353 = vmatpush.msra.mxu1 %v185_v58  ;;  %465 = vmatpush.msrb.mxu3 %v219_v32  ;;  %v254_v58 = vld [vmem:[#allocation5 + $0x448] sm:$0xff]  ;;  %v279_v32 = vld [vmem:[#allocation5 + $0x510] sm:$0xff] }
  0x4c   :  { %v245_v61 = vld [vmem:[#allocation5 + $0x400] sm:$0xff]  ;;  %334 = vmatpush.msra.mxu0 %v117_v60  ;;  %v191_v60 = vld [vmem:[#allocation5 + $0x250] sm:$0xff] }
  0x4d   :  { %v181_v1 = vld [vmem:[#allocation5 + $0x200] sm:$0xff]  ;;  %374 = vmatpush.msra.mxu2 %v245_v61  ;;  %335 = vmatmul.f32.vlgmr.msra.gmra.mxu0 %v1827_v3  ;;  %v182_v61 = vld [vmem:[#allocation5 + $0x208] sm:$0xff] }
  0x4e   :  { %375 = vmatmul.f32.vlgmr.msra.gmra.mxu2 %v1825_v62  ;;  %399 = vmatpush.msrb.mxu0 %v242_v63  ;;  %v250_v63 = vld [vmem:[#allocation5 + $0x428] sm:$0xff] }
  0x4f   :  { %439 = vmatpush.msrb.mxu2 %v179_v0  ;;  %354 = vmatpush.msra.mxu1 %v181_v1  ;;  %v119_v0 = vld [vmem:[#allocation5 + $0x10] sm:$0xff] }
  0x50   :  { %400 = vmatpush.msrb.mxu0 %v238_v4  ;;  %355 = vmatmul.f32.vlgmr.msra.gmra.mxu1 %v1831_v8  ;;  %v187_v1 = vld [vmem:[#allocation5 + $0x230] sm:$0xff] }
  0x51   :  { %419 = vmatpush.msrb.mxu1 %v306_v5  ;;  %440 = vmatpush.msrb.mxu2 %v175_v6  ;;  %v307_v4 = vld [vmem:[#allocation5 + $0x5f0] sm:$0xff]  ;;  %v246_v5 = vld [vmem:[#allocation5 + $0x408] sm:$0xff] }
  0x52   :  { %401 = vmatpush.msrb.mxu0 %v234_v9  ;;  %466 = vmatpush.msrb.mxu3 %v215_v36  ;;  %v183_v6 = vld [vmem:[#allocation5 + $0x210] sm:$0xff]  ;;  %v240_v9 = vld [vmem:[#allocation5 + $0x3d8] sm:$0xff] }
  0x53   :  { %420 = vmatpush.msrb.mxu1 %v302_v10  ;;  %441 = vmatpush.msrb.mxu2 %v171_v11  ;;  %v308_v10 = vld [vmem:[#allocation5 + $0x5f8] sm:$0xff]  ;;  %v275_v36 = vld [vmem:[#allocation5 + $0x4f0] sm:$0xff] }
  0x54   :  { %402 = vmatpush.msrb.mxu0 %v230_v13  ;;  %467 = vmatpush.msrb.mxu3 %v211_v40  ;;  %v180_v11 = vld [vmem:[#allocation5 + $0x1f8] sm:$0xff]  ;;  %v271_v40 = vld [vmem:[#allocation5 + $0x4d0] sm:$0xff] }
  0x55   :  { %421 = vmatpush.msrb.mxu1 %v298_v14  ;;  %442 = vmatpush.msrb.mxu2 %v167_v15  ;;  %v236_v13 = vld [vmem:[#allocation5 + $0x3b8] sm:$0xff] }
  0x56   :  { %403 = vmatpush.msrb.mxu0 %v226_v17  ;;  %468 = vmatpush.msrb.mxu3 %v207_v44  ;;  %v304_v14 = vld [vmem:[#allocation5 + $0x5d8] sm:$0xff]  ;;  %v267_v44 = vld [vmem:[#allocation5 + $0x4b0] sm:$0xff] }
  0x57   :  { %422 = vmatpush.msrb.mxu1 %v294_v18  ;;  %443 = vmatpush.msrb.mxu2 %v163_v19  ;;  %v176_v15 = vld [vmem:[#allocation5 + $0x1d8] sm:$0xff] }
  0x58   :  { %404 = vmatpush.msrb.mxu0 %v222_v21  ;;  %469 = vmatpush.msrb.mxu3 %v203_v48  ;;  %v232_v17 = vld [vmem:[#allocation5 + $0x398] sm:$0xff] }
  0x59   :  { %423 = vmatpush.msrb.mxu1 %v290_v22  ;;  %444 = vmatpush.msrb.mxu2 %v159_v23  ;;  %v300_v18 = vld [vmem:[#allocation5 + $0x5b8] sm:$0xff] }
  0x5a   :  { %405 = vmatpush.msrb.mxu0 %v218_v25  ;;  %470 = vmatpush.msrb.mxu3 %v199_v52  ;;  %v172_v19 = vld [vmem:[#allocation5 + $0x1b8] sm:$0xff] }
  0x5b   :  { %424 = vmatpush.msrb.mxu1 %v286_v26  ;;  %445 = vmatpush.msrb.mxu2 %v155_v27  ;;  %v228_v21 = vld [vmem:[#allocation5 + $0x378] sm:$0xff] }
  0x5c   :  { %406 = vmatpush.msrb.mxu0 %v214_v29  ;;  %471 = vmatpush.msrb.mxu3 %v195_v56  ;;  %v296_v22 = vld [vmem:[#allocation5 + $0x598] sm:$0xff] }
  0x5d   :  { %425 = vmatpush.msrb.mxu1 %v282_v30  ;;  %446 = vmatpush.msrb.mxu2 %v151_v31  ;;  %v168_v23 = vld [vmem:[#allocation5 + $0x198] sm:$0xff] }
  0x5e   :  { %407 = vmatpush.msrb.mxu0 %v210_v33  ;;  %472 = vmatpush.msrb.mxu3 %v191_v60  ;;  %v224_v25 = vld [vmem:[#allocation5 + $0x358] sm:$0xff] }
  0x5f   :  { %426 = vmatpush.msrb.mxu1 %v278_v34  ;;  %447 = vmatpush.msrb.mxu2 %v147_v35  ;;  %v292_v26 = vld [vmem:[#allocation5 + $0x578] sm:$0xff] }
  0x60   :  { %408 = vmatpush.msrb.mxu0 %v206_v37  ;;  %473 = vmatpush.msrb.mxu3 %v187_v1  ;;  %v164_v27 = vld [vmem:[#allocation5 + $0x178] sm:$0xff] }
  0x61   :  { %427 = vmatpush.msrb.mxu1 %v274_v38  ;;  %448 = vmatpush.msrb.mxu2 %v143_v39  ;;  %v220_v29 = vld [vmem:[#allocation5 + $0x338] sm:$0xff] }
  0x62   :  { %409 = vmatpush.msrb.mxu0 %v202_v41  ;;  %474 = vmatpush.msrb.mxu3 %v183_v6  ;;  %v288_v30 = vld [vmem:[#allocation5 + $0x558] sm:$0xff] }
  0x63   :  { %428 = vmatpush.msrb.mxu1 %v270_v42  ;;  %449 = vmatpush.msrb.mxu2 %v139_v43  ;;  %v160_v31 = vld [vmem:[#allocation5 + $0x158] sm:$0xff] }
  0x64   :  { %410 = vmatpush.msrb.mxu0 %v198_v45  ;;  %539 = vmatpush.msra.mxu3 %v308_v10  ;;  %v216_v33 = vld [vmem:[#allocation5 + $0x318] sm:$0xff]  ;;  %v605_v10 = vld [vmem:[#allocation7 + $0x150] sm:$0xff] }
  0x65   :  { %429 = vmatpush.msrb.mxu1 %v266_v46  ;;  %450 = vmatpush.msrb.mxu2 %v135_v47  ;;  %v284_v34 = vld [vmem:[#allocation5 + $0x538] sm:$0xff]  ;;  %v263_v47 = vld [vmem:[#allocation5 + $0x490] sm:$0xff] }
  0x66   :  { %411 = vmatpush.msrb.mxu0 %v194_v49  ;;  %540 = vmatpush.msra.mxu3 %v304_v14  ;;  %v156_v35 = vld [vmem:[#allocation5 + $0x138] sm:$0xff]  ;;  %v599_v14 = vld [vmem:[#allocation7 + $0x120] sm:$0xff] }
  0x67   :  { %430 = vmatpush.msrb.mxu1 %v262_v50  ;;  %451 = vmatpush.msrb.mxu2 %v131_v51  ;;  %v212_v37 = vld [vmem:[#allocation5 + $0x2f8] sm:$0xff]  ;;  %v259_v51 = vld [vmem:[#allocation5 + $0x470] sm:$0xff] }
  0x68   :  { %412 = vmatpush.msrb.mxu0 %v190_v53  ;;  %541 = vmatpush.msra.mxu3 %v300_v18  ;;  %v280_v38 = vld [vmem:[#allocation5 + $0x518] sm:$0xff]  ;;  %v644_v18 = vld [vmem:[#allocation7 + $0x288] sm:$0xff] }
  0x69   :  { %431 = vmatpush.msrb.mxu1 %v258_v54  ;;  %452 = vmatpush.msrb.mxu2 %v127_v55  ;;  %v152_v39 = vld [vmem:[#allocation5 + $0x118] sm:$0xff]  ;;  %v255_v55 = vld [vmem:[#allocation5 + $0x450] sm:$0xff] }
  0x6a   :  { %413 = vmatpush.msrb.mxu0 %v186_v57  ;;  %542 = vmatpush.msra.mxu3 %v296_v22  ;;  %v208_v41 = vld [vmem:[#allocation5 + $0x2d8] sm:$0xff]  ;;  %v635_v22 = vld [vmem:[#allocation7 + $0x240] sm:$0xff] }
  0x6b   :  { %432 = vmatpush.msrb.mxu1 %v254_v58  ;;  %453 = vmatpush.msrb.mxu2 %v123_v59  ;;  %v276_v42 = vld [vmem:[#allocation5 + $0x4f8] sm:$0xff]  ;;  %v251_v59 = vld [vmem:[#allocation5 + $0x430] sm:$0xff] }
  0x6c   :  { %414 = vmatpush.msrb.mxu0 %v182_v61  ;;  %543 = vmatpush.msra.mxu3 %v292_v26  ;;  %v148_v43 = vld [vmem:[#allocation5 + $0xf8] sm:$0xff]  ;;  %v629_v26 = vld [vmem:[#allocation7 + $0x210] sm:$0xff] }
  0x6d   :  { %433 = vmatpush.msrb.mxu1 %v250_v63  ;;  %454 = vmatpush.msrb.mxu2 %v119_v0  ;;  %v204_v45 = vld [vmem:[#allocation5 + $0x2b8] sm:$0xff]  ;;  %v247_v0 = vld [vmem:[#allocation5 + $0x410] sm:$0xff] }
  0x6e   :  { %415 = vmatmul.f32.vlgmr.msrb.gmra.mxu0 %v1831_v8  ;;  %544 = vmatpush.msra.mxu3 %v288_v30  ;;  %v272_v46 = vld [vmem:[#allocation5 + $0x4d8] sm:$0xff]  ;;  %v623_v30 = vld [vmem:[#allocation7 + $0x1e0] sm:$0xff] }
  0x6f   :  { %519 = vmatpush.msra.mxu2 %v244_v2  ;;  %479 = vmatpush.msra.mxu0 %v307_v4  ;;  %v144_v48 = vld [vmem:[#allocation5 + $0xd8] sm:$0xff] }
  0x70   :  { %434 = vmatpush.msrb.mxu1 %v246_v5  ;;  %545 = vmatpush.msra.mxu3 %v284_v34  ;;  %v200_v49 = vld [vmem:[#allocation5 + $0x298] sm:$0xff]  ;;  %v563_v34 = vld [vmem:[#allocation7] sm:$0xff] }
  0x71   :  { %435 = vmatmul.f32.vlgmr.msrb.gmra.mxu1 %v1825_v62  ;;  %480 = vmatpush.msra.mxu0 %v303_v7  ;;  %v268_v50 = vld [vmem:[#allocation5 + $0x4b8] sm:$0xff]  ;;  %v608_v7 = vld [vmem:[#allocation7 + $0x168] sm:$0xff] }
  0x72   :  { %520 = vmatpush.msra.mxu2 %v240_v9  ;;  %499 = vmatpush.msra.mxu1 %v180_v11  ;;  %v140_v52 = vld [vmem:[#allocation5 + $0xb8] sm:$0xff]  ;;  %v656_v11 = vld [vmem:[#allocation7 + $0x2e8] sm:$0xff] }
  0x73   :  { %481 = vmatpush.msra.mxu0 %v299_v12  ;;  %546 = vmatpush.msra.mxu3 %v280_v38  ;;  %v196_v53 = vld [vmem:[#allocation5 + $0x278] sm:$0xff] }
  0x74   :  { %521 = vmatpush.msra.mxu2 %v236_v13  ;;  %500 = vmatpush.msra.mxu1 %v176_v15  ;;  %v264_v54 = vld [vmem:[#allocation5 + $0x498] sm:$0xff]  ;;  %v653_v13 = vld [vmem:[#allocation7 + $0x2d0] sm:$0xff] }
  0x75   :  { %482 = vmatpush.msra.mxu0 %v295_v16  ;;  %547 = vmatpush.msra.mxu3 %v276_v42  ;;  %v136_v56 = vld [vmem:[#allocation5 + $0x98] sm:$0xff]  ;;  %v596_v16 = vld [vmem:[#allocation7 + $0x108] sm:$0xff]  ;;  %v611_v42 = vld [vmem:[#allocation7 + $0x180] sm:$0xff] }
  0x76   :  { %522 = vmatpush.msra.mxu2 %v232_v17  ;;  %501 = vmatpush.msra.mxu1 %v172_v19  ;;  %v192_v57 = vld [vmem:[#allocation5 + $0x258] sm:$0xff]  ;;  %v593_v17 = vld [vmem:[#allocation7 + $0xf0] sm:$0xff] }
  0x77   :  { %483 = vmatpush.msra.mxu0 %v291_v20  ;;  %548 = vmatpush.msra.mxu3 %v272_v46  ;;  %v260_v58 = vld [vmem:[#allocation5 + $0x478] sm:$0xff]  ;;  %v587_v20 = vld [vmem:[#allocation7 + $0xc0] sm:$0xff]  ;;  %v597_v46 = vld [vmem:[#allocation7 + $0x110] sm:$0xff] }
  0x78   :  { %523 = vmatpush.msra.mxu2 %v228_v21  ;;  %502 = vmatpush.msra.mxu1 %v168_v23  ;;  %v132_v60 = vld [vmem:[#allocation5 + $0x78] sm:$0xff]  ;;  %v584_v21 = vld [vmem:[#allocation7 + $0xa8] sm:$0xff]  ;;  %v581_v23 = vld [vmem:[#allocation7 + $0x90] sm:$0xff] }
  0x79   :  { %484 = vmatpush.msra.mxu0 %v287_v24  ;;  %455 = vmatmul.f32.vlgmr.msrb.gmra.mxu2 %v1827_v3  ;;  %v188_v61 = vld [vmem:[#allocation5 + $0x238] sm:$0xff]  ;;  %v632_v24 = vld [vmem:[#allocation7 + $0x228] sm:$0xff] }
  0x7a   :  { %524 = vmatpush.msra.mxu2 %v224_v25  ;;  %503 = vmatpush.msra.mxu1 %v164_v27  ;;  %v256_v63 = vld [vmem:[#allocation5 + $0x458] sm:$0xff]  ;;  %v575_v27 = vld [vmem:[#allocation7 + $0x60] sm:$0xff] }
  0x7b   :  { %485 = vmatpush.msra.mxu0 %v283_v28  ;;  %549 = vmatpush.msra.mxu3 %v268_v50  ;;  %v128_v1 = vld [vmem:[#allocation5 + $0x58] sm:$0xff] }
  0x7c   :  { %525 = vmatpush.msra.mxu2 %v220_v29  ;;  %504 = vmatpush.msra.mxu1 %v160_v31  ;;  %v184_v2 = vld [vmem:[#allocation5 + $0x218] sm:$0xff]  ;;  %v572_v29 = vld [vmem:[#allocation7 + $0x48] sm:$0xff]  ;;  %v569_v31 = vld [vmem:[#allocation7 + $0x30] sm:$0xff] }
  0x7d   :  { %486 = vmatpush.msra.mxu0 %v279_v32  ;;  %475 = vmatmul.f32.vlgmr.msrb.gmra.mxu3 %v1831_v8  ;;  %v252_v4 = vld [vmem:[#allocation5 + $0x438] sm:$0xff]  ;;  %v620_v32 = vld [vmem:[#allocation7 + $0x1c8] sm:$0xff] }
  0x7e   :  { %526 = vmatpush.msra.mxu2 %v216_v33  ;;  %505 = vmatpush.msra.mxu1 %v156_v35  ;;  %v124_v5 = vld [vmem:[#allocation5 + $0x38] sm:$0xff]  ;;  %v617_v35 = vld [vmem:[#allocation7 + $0x1b0] sm:$0xff] }
  0x7f   :  { %487 = vmatpush.msra.mxu0 %v275_v36  ;;  %550 = vmatpush.msra.mxu3 %v264_v54  ;;  %v248_v6 = vld [vmem:[#allocation5 + $0x418] sm:$0xff]  ;;  %v609_v36 = vld [vmem:[#allocation7 + $0x170] sm:$0xff] }
  0x80   :  { %527 = vmatpush.msra.mxu2 %v212_v37  ;;  %506 = vmatpush.msra.mxu1 %v152_v39  ;;  %v120_v9 = vld [vmem:[#allocation5 + $0x18] sm:$0xff]  ;;  %v704_v39 = vld [vmem:[#allocation7 + $0x468] sm:$0xff]  ;;  %v749_v54 = vld [vmem:[#allocation7 + $0x5d0] sm:$0xff] }
  0x81   :  { %488 = vmatpush.msra.mxu0 %v271_v40  ;;  %551 = vmatpush.msra.mxu3 %v260_v58  ;;  %v602_v12 = vld [vmem:[#allocation7 + $0x138] sm:$0xff]  ;;  %v603_v40 = vld [vmem:[#allocation7 + $0x140] sm:$0xff] }
  0x82   :  { %528 = vmatpush.msra.mxu2 %v208_v41  ;;  %507 = vmatpush.msra.mxu1 %v148_v43  ;;  %v650_v15 = vld [vmem:[#allocation7 + $0x2b8] sm:$0xff]  ;;  %v600_v41 = vld [vmem:[#allocation7 + $0x128] sm:$0xff]  ;;  %v701_v43 = vld [vmem:[#allocation7 + $0x450] sm:$0xff] }
  0x83   :  { %489 = vmatpush.msra.mxu0 %v267_v44  ;;  %552 = vmatpush.msra.mxu3 %v256_v63  ;;  %v590_v19 = vld [vmem:[#allocation7 + $0xd8] sm:$0xff]  ;;  %v657_v44 = vld [vmem:[#allocation7 + $0x2f0] sm:$0xff]  ;;  %v743_v63 = vld [vmem:[#allocation7 + $0x5a0] sm:$0xff] }
  0x84   :  { %529 = vmatpush.msra.mxu2 %v204_v45  ;;  %508 = vmatpush.msra.mxu1 %v144_v48  ;;  %v578_v25 = vld [vmem:[#allocation7 + $0x78] sm:$0xff]  ;;  %v695_v48 = vld [vmem:[#allocation7 + $0x420] sm:$0xff] }
  0x85   :  { %490 = vmatpush.msra.mxu0 %v263_v47  ;;  %553 = vmatpush.msra.mxu3 %v252_v4  ;;  %v626_v28 = vld [vmem:[#allocation7 + $0x1f8] sm:$0xff]  ;;  %v740_v4 = vld [vmem:[#allocation7 + $0x588] sm:$0xff] }
  0x86   :  { %530 = vmatpush.msra.mxu2 %v200_v49  ;;  %509 = vmatpush.msra.mxu1 %v140_v52  ;;  %v566_v33 = vld [vmem:[#allocation7 + $0x18] sm:$0xff]  ;;  %v651_v49 = vld [vmem:[#allocation7 + $0x2c0] sm:$0xff]  ;;  %v692_v52 = vld [vmem:[#allocation7 + $0x408] sm:$0xff] }
  0x87   :  { %491 = vmatpush.msra.mxu0 %v259_v51  ;;  %554 = vmatpush.msra.mxu3 %v248_v6  ;;  %v606_v37 = vld [vmem:[#allocation7 + $0x158] sm:$0xff]  ;;  %v752_v51 = vld [vmem:[#allocation7 + $0x5e8] sm:$0xff] }
  0x88   :  { %531 = vmatpush.msra.mxu2 %v196_v53  ;;  %510 = vmatpush.msra.mxu1 %v136_v56  ;;  %v614_v38 = vld [vmem:[#allocation7 + $0x198] sm:$0xff]  ;;  %v648_v53 = vld [vmem:[#allocation7 + $0x2a8] sm:$0xff]  ;;  %v689_v56 = vld [vmem:[#allocation7 + $0x3f0] sm:$0xff] }
  0x89   :  { %492 = vmatpush.msra.mxu0 %v255_v55  ;;  %555 = vmatmul.f32.vlgmr.msra.gmra.mxu3 %v1825_v62  ;;  %v698_v45 = vld [vmem:[#allocation7 + $0x438] sm:$0xff]  ;;  %v591_v55 = vld [vmem:[#allocation7 + $0xe0] sm:$0xff]  ;;  %v680_v6 = vld [vmem:[#allocation7 + $0x3a8] sm:$0xff] }
  0x8a   :  { %532 = vmatpush.msra.mxu2 %v192_v57  ;;  %511 = vmatpush.msra.mxu1 %v132_v60  ;;  %v654_v47 = vld [vmem:[#allocation7 + $0x2d8] sm:$0xff]  ;;  %v645_v57 = vld [vmem:[#allocation7 + $0x290] sm:$0xff] }
  0x8b   :  { %493 = vmatpush.msra.mxu0 %v251_v59  ;;  %v594_v50 = vld [vmem:[#allocation7 + $0xf8] sm:$0xff]  ;;  %823 = vmatpush.msrb.mxu3 %v752_v51  ;;  %v588_v59 = vld [vmem:[#allocation7 + $0xc8] sm:$0xff] }
  0x8c   :  { %533 = vmatpush.msra.mxu2 %v188_v61  ;;  %512 = vmatpush.msra.mxu1 %v128_v1  ;;  %v746_v58 = vld [vmem:[#allocation7 + $0x5b8] sm:$0xff]  ;;  %v683_v1 = vld [vmem:[#allocation7 + $0x3c0] sm:$0xff]  ;;  %v604_v51 = vld [vmem:[#allocation7 + $0x148] sm:$0xff] }
  0x8d   :  { %494 = vmatpush.msra.mxu0 %v247_v0  ;;  %824 = vmatpush.msrb.mxu3 %v749_v54  ;;  %v686_v60 = vld [vmem:[#allocation7 + $0x3d8] sm:$0xff]  ;;  %v585_v0 = vld [vmem:[#allocation7 + $0xb0] sm:$0xff] }
  0x8e   :  { %534 = vmatpush.msra.mxu2 %v184_v2  ;;  %495 = vmatmul.f32.vlgmr.msra.gmra.mxu0 %v1825_v62  ;;  %v641_v62 = vld [vmem:[#allocation7 + $0x270] sm:$0xff]  ;;  %v642_v61 = vld [vmem:[#allocation7 + $0x278] sm:$0xff]  ;;  %v639_v2 = vld [vmem:[#allocation7 + $0x260] sm:$0xff] }
  0x8f   :  { %535 = vmatmul.f32.vlgmr.msra.gmra.mxu2 %v1831_v8  ;;  %513 = vmatpush.msra.mxu1 %v124_v5  ;;  %v647_v8 = vld [vmem:[#allocation7 + $0x2a0] sm:$0xff]  ;;  %v582_v5 = vld [vmem:[#allocation7 + $0x98] sm:$0xff]  ;;  %v601_v54 = vld [vmem:[#allocation7 + $0x130] sm:$0xff] }
  0x90   :  { %763 = vmatpush.msrb.mxu0 %v608_v7  ;;  %803 = vmatpush.msrb.mxu2 %v704_v39  ;;  %v636_v7 = vld [vmem:[#allocation7 + $0x248] sm:$0xff] }
  0x91   :  { %514 = vmatpush.msra.mxu1 %v120_v9  ;;  %825 = vmatpush.msrb.mxu3 %v746_v58  ;;  %v737_v9 = vld [vmem:[#allocation7 + $0x570] sm:$0xff]  ;;  %v690_v58 = vld [vmem:[#allocation7 + $0x3f8] sm:$0xff] }
  0x92   :  { %515 = vmatmul.f32.vlgmr.msra.gmra.mxu1 %v1827_v3  ;;  %764 = vmatpush.msrb.mxu0 %v605_v10  ;;  %v638_v3 = vld [vmem:[#allocation7 + $0x258] sm:$0xff]  ;;  %v579_v10 = vld [vmem:[#allocation7 + $0x80] sm:$0xff] }
  0x93   :  { %783 = vmatpush.msrb.mxu1 %v656_v11  ;;  %804 = vmatpush.msrb.mxu2 %v701_v43  ;;  %v677_v11 = vld [vmem:[#allocation7 + $0x390] sm:$0xff]  ;;  %v612_v43 = vld [vmem:[#allocation7 + $0x188] sm:$0xff] }
  0x94   :  { %765 = vmatpush.msrb.mxu0 %v602_v12  ;;  %826 = vmatpush.msrb.mxu3 %v743_v63  ;;  %v633_v12 = vld [vmem:[#allocation7 + $0x230] sm:$0xff]  ;;  %v747_v63 = vld [vmem:[#allocation7 + $0x5c0] sm:$0xff] }
  0x95   :  { %784 = vmatpush.msrb.mxu1 %v653_v13  ;;  %805 = vmatpush.msrb.mxu2 %v698_v45  ;;  %v734_v13 = vld [vmem:[#allocation7 + $0x558] sm:$0xff] }
  0x96   :  { %766 = vmatpush.msrb.mxu0 %v599_v14  ;;  %827 = vmatpush.msrb.mxu3 %v740_v4  ;;  %v576_v14 = vld [vmem:[#allocation7 + $0x68] sm:$0xff]  ;;  %v610_v45 = vld [vmem:[#allocation7 + $0x178] sm:$0xff]  ;;  %v589_v4 = vld [vmem:[#allocation7 + $0xd0] sm:$0xff] }
  0x97   :  { %785 = vmatpush.msrb.mxu1 %v650_v15  ;;  %806 = vmatpush.msrb.mxu2 %v695_v48  ;;  %v674_v15 = vld [vmem:[#allocation7 + $0x378] sm:$0xff]  ;;  %v607_v48 = vld [vmem:[#allocation7 + $0x160] sm:$0xff] }
  0x98   :  { %767 = vmatpush.msrb.mxu0 %v596_v16  ;;  %828 = vmatpush.msrb.mxu3 %v737_v9  ;;  %v630_v16 = vld [vmem:[#allocation7 + $0x218] sm:$0xff] }
  0x99   :  { %786 = vmatpush.msrb.mxu1 %v647_v8  ;;  %807 = vmatpush.msrb.mxu2 %v692_v52  ;;  %v731_v8 = vld [vmem:[#allocation7 + $0x540] sm:$0xff]  ;;  %v696_v52 = vld [vmem:[#allocation7 + $0x428] sm:$0xff]  ;;  %v678_v9 = vld [vmem:[#allocation7 + $0x398] sm:$0xff] }
  0x9a   :  { %768 = vmatpush.msrb.mxu0 %v593_v17  ;;  %829 = vmatpush.msrb.mxu3 %v734_v13  ;;  %v1843_v17 = vld [vmem:[#allocation11] sm:$0xf] }
  0x9b   :  { %787 = vmatpush.msrb.mxu1 %v644_v18  ;;  %808 = vmatpush.msrb.mxu2 %v689_v56  ;;  %v573_v18 = vld [vmem:[#allocation7 + $0x50] sm:$0xff]  ;;  %v312_v13 = vperm.slane %v1843_v17, 1 }
  0x9c   :  { %769 = vmatpush.msrb.mxu0 %v590_v19  ;;  %v671_v19 = vld [vmem:[#allocation7 + $0x360] sm:$0xff]  ;;  %830 = vmatpush.msrb.mxu3 %v731_v8  ;;  %v753_v56 = vld [vmem:[#allocation7 + $0x5f0] sm:$0xff]  ;;  %v732_v8 = vld [vmem:[#allocation7 + $0x548] sm:$0xff] }
  0x9d   :  { %788 = vmatpush.msrb.mxu1 %v641_v62  ;;  %809 = vmatpush.msrb.mxu2 %v686_v60  ;;  %v627_v62 = vld [vmem:[#allocation7 + $0x200] sm:$0xff] }
  0x9e   :  { %770 = vmatpush.msrb.mxu0 %v587_v20  ;;  %v570_v20 = vld [vmem:[#allocation7 + $0x38] sm:$0xff]  ;;  %v595_v60 = vld [vmem:[#allocation7 + $0x100] sm:$0xff] }
  0x9f   :  { %789 = vmatpush.msrb.mxu1 %v638_v3  ;;  %810 = vmatpush.msrb.mxu2 %v683_v1  ;;  %v311_v3 = vperm.slane %v1843_v17, 0  ;;  %v684_v1 = vld [vmem:[#allocation7 + $0x3c8] sm:$0xff] }
  0xa0   :  { %771 = vmatpush.msrb.mxu0 %v584_v21  ;;  %v567_v21 = vld [vmem:[#allocation7 + $0x20] sm:$0xff] }
  0xa1   :  { %790 = vmatpush.msrb.mxu1 %v635_v22  ;;  %811 = vmatpush.msrb.mxu2 %v680_v6  ;;  %v668_v22 = vld [vmem:[#allocation7 + $0x348] sm:$0xff]  ;;  %v741_v6 = vld [vmem:[#allocation7 + $0x590] sm:$0xff] }
  0xa2   :  { %772 = vmatpush.msrb.mxu0 %v581_v23  ;;  %v728_v23 = vld [vmem:[#allocation7 + $0x528] sm:$0xff] }
  0xa3   :  { %791 = vmatpush.msrb.mxu1 %v632_v24  ;;  %812 = vmatpush.msrb.mxu2 %v677_v11  ;;  %v624_v24 = vld [vmem:[#allocation7 + $0x1e8] sm:$0xff]  ;;  %v583_v11 = vld [vmem:[#allocation7 + $0xa0] sm:$0xff] }
  0xa4   :  { %773 = vmatpush.msrb.mxu0 %v578_v25  ;;  %831 = vmatpush.msrb.mxu3 %v728_v23 }
  0xa5   :  { %792 = vmatpush.msrb.mxu1 %v629_v26  ;;  %813 = vmatpush.msrb.mxu2 %v674_v15  ;;  %v564_v26 = vld [vmem:[#allocation7 + $0x8] sm:$0xff] }
  0xa6   :  { %774 = vmatpush.msrb.mxu0 %v575_v27  ;;  %v580_v15 = vld [vmem:[#allocation7 + $0x88] sm:$0xff] }
  0xa7   :  { %793 = vmatpush.msrb.mxu1 %v626_v28  ;;  %814 = vmatpush.msrb.mxu2 %v671_v19  ;;  %v665_v28 = vld [vmem:[#allocation7 + $0x330] sm:$0xff] }
  0xa8   :  { %775 = vmatpush.msrb.mxu0 %v572_v29  ;;  %v725_v29 = vld [vmem:[#allocation7 + $0x510] sm:$0xff] }
  0xa9   :  { %794 = vmatpush.msrb.mxu1 %v623_v30  ;;  %815 = vmatpush.msrb.mxu2 %v668_v22  ;;  %v621_v30 = vld [vmem:[#allocation7 + $0x1d0] sm:$0xff]  ;;  %v574_v22 = vld [vmem:[#allocation7 + $0x58] sm:$0xff] }
  0xaa   :  { %776 = vmatpush.msrb.mxu0 %v569_v31  ;;  %832 = vmatpush.msrb.mxu3 %v725_v29  ;;  %v577_v19 = vld [vmem:[#allocation7 + $0x70] sm:$0xff]  ;;  %v663_v29 = vld [vmem:[#allocation7 + $0x320] sm:$0xff] }
  0xab   :  { %795 = vmatpush.msrb.mxu1 %v620_v32  ;;  %816 = vmatpush.msrb.mxu2 %v665_v28 }
  0xac   :  { %777 = vmatpush.msrb.mxu0 %v566_v33 }
  0xad   :  { %796 = vmatpush.msrb.mxu1 %v617_v35  ;;  %v722_v35 = vld [vmem:[#allocation7 + $0x4f8] sm:$0xff] }
  0xae   :  { %778 = vmatpush.msrb.mxu0 %v563_v34  ;;  %v662_v34 = vld [vmem:[#allocation7 + $0x318] sm:$0xff]  ;;  %833 = vmatpush.msrb.mxu3 %v722_v35  ;;  %v565_v35 = vld [vmem:[#allocation7 + $0x10] sm:$0xff] }
  0xaf   :  { %797 = vmatpush.msrb.mxu1 %v614_v38  ;;  %817 = vmatpush.msrb.mxu2 %v662_v34  ;;  %v719_v38 = vld [vmem:[#allocation7 + $0x4e0] sm:$0xff]  ;;  %v660_v34 = vld [vmem:[#allocation7 + $0x308] sm:$0xff] }
  0xb0   :  { %843 = vmatpush.msra.mxu0 %v609_v36  ;;  %v618_v36 = vld [vmem:[#allocation7 + $0x1b8] sm:$0xff]  ;;  %834 = vmatpush.msrb.mxu3 %v719_v38  ;;  %v717_v38 = vld [vmem:[#allocation7 + $0x4d0] sm:$0xff] }
  0xb1   :  { %798 = vmatpush.msrb.mxu1 %v611_v42  ;;  %v716_v42 = vld [vmem:[#allocation7 + $0x4c8] sm:$0xff] }
  0xb2   :  { %844 = vmatpush.msra.mxu0 %v606_v37  ;;  %v659_v37 = vld [vmem:[#allocation7 + $0x300] sm:$0xff]  ;;  %835 = vmatpush.msrb.mxu3 %v716_v42 }
  0xb3   :  { %863 = vmatpush.msra.mxu1 %v657_v44  ;;  %818 = vmatpush.msrb.mxu2 %v659_v37  ;;  %v655_v37 = vld [vmem:[#allocation7 + $0x2e0] sm:$0xff] }
  0xb4   :  { %845 = vmatpush.msra.mxu0 %v603_v40  ;;  %v615_v40 = vld [vmem:[#allocation7 + $0x1a0] sm:$0xff] }
  0xb5   :  { %864 = vmatpush.msra.mxu1 %v654_v47  ;;  %v713_v47 = vld [vmem:[#allocation7 + $0x4b0] sm:$0xff]  ;;  %v711_v42 = vld [vmem:[#allocation7 + $0x4a0] sm:$0xff] }
  0xb6   :  { %846 = vmatpush.msra.mxu0 %v600_v41  ;;  %v705_v41 = vld [vmem:[#allocation7 + $0x470] sm:$0xff]  ;;  %836 = vmatpush.msrb.mxu3 %v713_v47  ;;  %v640_v47 = vld [vmem:[#allocation7 + $0x268] sm:$0xff] }
  0xb7   :  { %865 = vmatpush.msra.mxu1 %v651_v49  ;;  %883 = vmatpush.msra.mxu2 %v705_v41  ;;  %v699_v49 = vld [vmem:[#allocation7 + $0x440] sm:$0xff]  ;;  %v649_v41 = vld [vmem:[#allocation7 + $0x2b0] sm:$0xff] }
  0xb8   :  { %847 = vmatpush.msra.mxu0 %v597_v46  ;;  %v702_v46 = vld [vmem:[#allocation7 + $0x458] sm:$0xff] }
  0xb9   :  { %866 = vmatpush.msra.mxu1 %v648_v53  ;;  %884 = vmatpush.msra.mxu2 %v702_v46  ;;  %v707_v53 = vld [vmem:[#allocation7 + $0x480] sm:$0xff] }
  0xba   :  { %848 = vmatpush.msra.mxu0 %v594_v50  ;;  %v710_v50 = vld [vmem:[#allocation7 + $0x498] sm:$0xff]  ;;  %v643_v46 = vld [vmem:[#allocation7 + $0x280] sm:$0xff] }
  0xbb   :  { %867 = vmatpush.msra.mxu1 %v645_v57  ;;  %885 = vmatpush.msra.mxu2 %v699_v49  ;;  %v598_v57 = vld [vmem:[#allocation7 + $0x118] sm:$0xff]  ;;  %v631_v49 = vld [vmem:[#allocation7 + $0x220] sm:$0xff] }
  0xbc   :  { %849 = vmatpush.msra.mxu0 %v591_v55  ;;  %837 = vmatpush.msrb.mxu3 %v710_v50  ;;  %v693_v55 = vld [vmem:[#allocation7 + $0x410] sm:$0xff]  ;;  %v313_v50 = vperm.slane %v1843_v17, 2 }
  0xbd   :  { %868 = vmatpush.msra.mxu1 %v642_v61  ;;  %886 = vmatpush.msra.mxu2 %v696_v52  ;;  %v687_v61 = vld [vmem:[#allocation7 + $0x3e0] sm:$0xff]  ;;  %v625_v52 = vld [vmem:[#allocation7 + $0x1f0] sm:$0xff] }
  0xbe   :  { %850 = vmatpush.msra.mxu0 %v588_v59  ;;  %838 = vmatpush.msrb.mxu3 %v707_v53  ;;  %v750_v59 = vld [vmem:[#allocation7 + $0x5d8] sm:$0xff] }
  0xbf   :  { %869 = vmatpush.msra.mxu1 %v639_v2  ;;  %887 = vmatpush.msra.mxu2 %v693_v55  ;;  %v744_v2 = vld [vmem:[#allocation7 + $0x5a8] sm:$0xff]  ;;  %v622_v55 = vld [vmem:[#allocation7 + $0x1d8] sm:$0xff] }
  0xc0   :  { %851 = vmatpush.msra.mxu0 %v585_v0  ;;  %903 = vmatpush.msra.mxu3 %v753_v56  ;;  %v592_v0 = vld [vmem:[#allocation7 + $0xe8] sm:$0xff] }
  0xc1   :  { %870 = vmatpush.msra.mxu1 %v636_v7  ;;  %888 = vmatpush.msra.mxu2 %v690_v58  ;;  %v586_v7 = vld [vmem:[#allocation7 + $0xb8] sm:$0xff] }
  0xc2   :  { %852 = vmatpush.msra.mxu0 %v582_v5  ;;  %904 = vmatpush.msra.mxu3 %v750_v59  ;;  %v681_v5 = vld [vmem:[#allocation7 + $0x3b0] sm:$0xff] }
  0xc3   :  { %871 = vmatpush.msra.mxu1 %v633_v12  ;;  %889 = vmatpush.msra.mxu2 %v687_v61  ;;  %v675_v12 = vld [vmem:[#allocation7 + $0x380] sm:$0xff] }
  0xc4   :  { %853 = vmatpush.msra.mxu0 %v579_v10  ;;  %905 = vmatpush.msra.mxu3 %v747_v63  ;;  %v738_v10 = vld [vmem:[#allocation7 + $0x578] sm:$0xff]  ;;  %v314_v63 = vperm.slane %v1843_v17, 3  ;;  %v697_v17 = vld [vmem:[#allocation7 + $0x430] sm:$0xff] }
  0xc5   :  { %872 = vmatpush.msra.mxu1 %v630_v16  ;;  %890 = vmatpush.msra.mxu2 %v684_v1  ;;  %v672_v16 = vld [vmem:[#allocation7 + $0x368] sm:$0xff] }
  0xc6   :  { %854 = vmatpush.msra.mxu0 %v576_v14  ;;  %906 = vmatpush.msra.mxu3 %v744_v2  ;;  %v735_v14 = vld [vmem:[#allocation7 + $0x560] sm:$0xff]  ;;  %v706_v2 = vld [vmem:[#allocation7 + $0x478] sm:$0xff] }
  0xc7   :  { %873 = vmatpush.msra.mxu1 %v627_v62  ;;  %891 = vmatpush.msra.mxu2 %v681_v5 }
  0xc8   :  { %855 = vmatpush.msra.mxu0 %v573_v18  ;;  %907 = vmatpush.msra.mxu3 %v741_v6  ;;  %v396_v18 = vpop.f32.mrf.mxu3  ;;  %v703_v6 = vld [vmem:[#allocation7 + $0x460] sm:$0xff] }
  0xc9   :  { %874 = vmatpush.msra.mxu1 %v624_v24  ;;  %892 = vmatpush.msra.mxu2 %v678_v9  ;;  %v397_v62 = vadd.f32 %v396_v18, %v312_v13  ;;  %v666_v24 = vld [vmem:[#allocation7 + $0x338] sm:$0xff]  ;;  %v700_v9 = vld [vmem:[#allocation7 + $0x448] sm:$0xff] }
  0xca   :  { %856 = vmatpush.msra.mxu0 %v570_v20  ;;  %v336_v25 = vpop.f32.mrf.mxu0  ;;  %908 = vmatpush.msra.mxu3 %v738_v10  ;;  %v669_v20 = vld [vmem:[#allocation7 + $0x350] sm:$0xff]  ;;  %v694_v13 = vld [vmem:[#allocation7 + $0x418] sm:$0xff]  ;;  %v688_v18 = vld [vmem:[#allocation7 + $0x3e8] sm:$0xff] }
  0xcb   :  { %v337_v27 = vadd.f32 %v336_v25, %v311_v3  ;;  %875 = vmatpush.msra.mxu1 %v621_v30  ;;  %893 = vmatpush.msra.mxu2 %v675_v12  ;;  %v729_v3 = vld [vmem:[#allocation7 + $0x530] sm:$0xff]  ;;  %v726_v25 = vld [vmem:[#allocation7 + $0x518] sm:$0xff]  ;;  %v723_v30 = vld [vmem:[#allocation7 + $0x500] sm:$0xff] }
  0xcc   :  { %857 = vmatpush.msra.mxu0 %v567_v21  ;;  %909 = vmatpush.msra.mxu3 %v735_v14 }
  0xcd   :  { %v356_v31 = vpop.f32.mrf.mxu1  ;;  %876 = vmatpush.msra.mxu1 %v618_v36  ;;  %894 = vmatpush.msra.mxu2 %v672_v16  ;;  %v720_v36 = vld [vmem:[#allocation7 + $0x4e8] sm:$0xff]  ;;  %v691_v16 = vld [vmem:[#allocation7 + $0x400] sm:$0xff] }
  0xce   :  { %858 = vmatpush.msra.mxu0 %v564_v26  ;;  %v357_v32 = vadd.f32 %v356_v31, %v337_v27  ;;  %910 = vmatpush.msra.mxu3 %v732_v8  ;;  %v571_v27 = vld [vmem:[#allocation7 + $0x40] sm:$0xff]  ;;  %v568_v31 = vld [vmem:[#allocation7 + $0x28] sm:$0xff] }
  0xcf   :  { %877 = vmatpush.msra.mxu1 %v615_v40  ;;  %895 = vmatpush.msra.mxu2 %v669_v20  ;;  %v714_v40 = vld [vmem:[#allocation7 + $0x4b8] sm:$0xff]  ;;  %v751_v8 = vld [vmem:[#allocation7 + $0x5e0] sm:$0xff]  ;;  %v745_v20 = vld [vmem:[#allocation7 + $0x5b0] sm:$0xff] }
  0xd0   :  { %911 = vmatpush.msra.mxu3 %v729_v3  ;;  %v682_v3 = vld [vmem:[#allocation7 + $0x3b8] sm:$0xff] }
  0xd1   :  { %v376_v33 = vpop.f32.mrf.mxu2  ;;  %878 = vmatpush.msra.mxu1 %v612_v43  ;;  %896 = vmatpush.msra.mxu2 %v666_v24  ;;  %v646_v43 = vld [vmem:[#allocation7 + $0x298] sm:$0xff]  ;;  %v676_v24 = vld [vmem:[#allocation7 + $0x388] sm:$0xff] }
  0xd2   :  { %v377_v39 = vadd.f32 %v376_v33, %v357_v32  ;;  %912 = vmatpush.msra.mxu3 %v726_v25  ;;  %v658_v33 = vld [vmem:[#allocation7 + $0x2f8] sm:$0xff]  ;;  %v736_v25 = vld [vmem:[#allocation7 + $0x568] sm:$0xff] }
  0xd3   :  { %897 = vmatpush.msra.mxu2 %v663_v29  ;;  %v730_v29 = vld [vmem:[#allocation7 + $0x538] sm:$0xff] }
  0xd4   :  { %v1846_v44 = vmax.f32 %v377_v39, 0.0  ;;  %913 = vmatpush.msra.mxu3 %v723_v30  ;;  %v652_v39 = vld [vmem:[#allocation7 + $0x2c8] sm:$0xff]  ;;  %v667_v30 = vld [vmem:[#allocation7 + $0x340] sm:$0xff] }
  0xd5   :  { %898 = vmatpush.msra.mxu2 %v660_v34  ;;  %v661_v34 = vld [vmem:[#allocation7 + $0x310] sm:$0xff] }
  0xd6   :  { %779 = vmatmul.f32.vlgmr.msrb.gmra.mxu0 %v1846_v44  ;;  %914 = vmatpush.msra.mxu3 %v720_v36  ;;  %v718_v36 = vld [vmem:[#allocation7 + $0x4d8] sm:$0xff] }
  0xd7   :  { %923 = vmatpush.msrb.mxu0 %v610_v45  ;;  %v708_v45 = vld [vmem:[#allocation7 + $0x488] sm:$0xff] }
  0xd8   :  { %915 = vmatpush.msra.mxu3 %v717_v38  ;;  %v1036_v38 = vld [vmem:[#allocation8 + $0xf0] sm:$0xff] }
  0xd9   :  { %924 = vmatpush.msrb.mxu0 %v607_v48  ;;  %v637_v48 = vld [vmem:[#allocation7 + $0x250] sm:$0xff] }
  0xda   :  { %916 = vmatpush.msra.mxu3 %v714_v40  ;;  %v709_v40 = vld [vmem:[#allocation7 + $0x490] sm:$0xff] }
  0xdb   :  { %925 = vmatpush.msrb.mxu0 %v604_v51  ;;  %v628_v51 = vld [vmem:[#allocation7 + $0x208] sm:$0xff] }
  0xdc   :  { %917 = vmatpush.msra.mxu3 %v711_v42  ;;  %v1032_v42 = vld [vmem:[#allocation8 + $0xd0] sm:$0xff] }
  0xdd   :  { %926 = vmatpush.msrb.mxu0 %v601_v54 }
  0xde   :  { %859 = vmatmul.f32.vlgmr.msra.gmra.mxu0 %v1846_v44  ;;  %918 = vmatpush.msra.mxu3 %v708_v45  ;;  %v1028_v45 = vld [vmem:[#allocation8 + $0xb0] sm:$0xff] }
  0xdf   :  { %927 = vmatpush.msrb.mxu0 %v598_v57  ;;  %v619_v57 = vld [vmem:[#allocation7 + $0x1c0] sm:$0xff] }
  0xe1   :  { %928 = vmatpush.msrb.mxu0 %v595_v60  ;;  %v616_v60 = vld [vmem:[#allocation7 + $0x1a8] sm:$0xff] }
  0xe3   :  { %929 = vmatpush.msrb.mxu0 %v592_v0  ;;  %v613_v0 = vld [vmem:[#allocation7 + $0x190] sm:$0xff] }
  0xe5   :  { %930 = vmatpush.msrb.mxu0 %v589_v4 }
  0xe7   :  { %931 = vmatpush.msrb.mxu0 %v586_v7 }
  0xe9   :  { %932 = vmatpush.msrb.mxu0 %v583_v11 }
  0xeb   :  { %933 = vmatpush.msrb.mxu0 %v580_v15  ;;  %v416_v21 = vpop.f32.mrf.mxu0  ;;  %v754_v15 = vld [vmem:[#allocation7 + $0x5f8] sm:$0xff] }
  0xec   :  { %v417_v23 = vadd.f32 %v416_v21, %v397_v62  ;;  %v685_v62 = vld [vmem:[#allocation7 + $0x3d0] sm:$0xff]  ;;  %v742_v21 = vld [vmem:[#allocation7 + $0x598] sm:$0xff] }
  0xed   :  { %934 = vmatpush.msrb.mxu0 %v577_v19  ;;  %v748_v19 = vld [vmem:[#allocation7 + $0x5c8] sm:$0xff] }
  0xee   :  { %v436_v26 = vpop.f32.mrf.mxu1 }
  0xef   :  { %v437_v28 = vadd.f32 %v436_v26, %v417_v23  ;;  %935 = vmatpush.msrb.mxu0 %v574_v22  ;;  %v679_v22 = vld [vmem:[#allocation7 + $0x3a0] sm:$0xff]  ;;  %v673_v26 = vld [vmem:[#allocation7 + $0x370] sm:$0xff] }
  0xf0   :  { %v739_v23 = vld [vmem:[#allocation7 + $0x580] sm:$0xff] }
  0xf1   :  { %v1851_v32 = vmax.f32 %v437_v28, 0.0  ;;  %936 = vmatpush.msrb.mxu0 %v571_v27  ;;  %v733_v27 = vld [vmem:[#allocation7 + $0x550] sm:$0xff]  ;;  %v670_v28 = vld [vmem:[#allocation7 + $0x358] sm:$0xff] }
  0xf3   :  { %799 = vmatmul.f32.vlgmr.msrb.gmra.mxu1 %v1851_v32  ;;  %937 = vmatpush.msrb.mxu0 %v568_v31  ;;  %v727_v31 = vld [vmem:[#allocation7 + $0x520] sm:$0xff] }
  0xf4   :  { %943 = vmatpush.msrb.mxu1 %v658_v33  ;;  %v724_v33 = vld [vmem:[#allocation7 + $0x508] sm:$0xff] }
  0xf5   :  { %938 = vmatpush.msrb.mxu0 %v565_v35  ;;  %v721_v35 = vld [vmem:[#allocation7 + $0x4f0] sm:$0xff] }
  0xf6   :  { %944 = vmatpush.msrb.mxu1 %v655_v37  ;;  %939 = vmatmul.f32.vlgmr.msrb.gmra.mxu0 %v1846_v44  ;;  %v634_v44 = vld [vmem:[#allocation7 + $0x238] sm:$0xff]  ;;  %v715_v37 = vld [vmem:[#allocation7 + $0x4c0] sm:$0xff] }
  0xf7   :  { %1108 = vmatpush.msra.mxu0 %v1036_v38  ;;  %v1045_v38 = vld [vmem:[#allocation8 + $0x138] sm:$0xff] }
  0xf8   :  { %945 = vmatpush.msrb.mxu1 %v652_v39  ;;  %v712_v39 = vld [vmem:[#allocation7 + $0x4a8] sm:$0xff] }
  0xfa   :  { %946 = vmatpush.msrb.mxu1 %v649_v41  ;;  %v1034_v41 = vld [vmem:[#allocation8 + $0xe0] sm:$0xff] }
  0xfb   :  { %879 = vmatmul.f32.vlgmr.msra.gmra.mxu1 %v1851_v32  ;;  %1109 = vmatpush.msra.mxu0 %v1034_v41  ;;  %v1043_v41 = vld [vmem:[#allocation8 + $0x128] sm:$0xff] }
  0xfc   :  { %947 = vmatpush.msrb.mxu1 %v646_v43  ;;  %v456_v53 = vpop.f32.mrf.mxu2  ;;  %v1030_v43 = vld [vmem:[#allocation8 + $0xc0] sm:$0xff] }
  0xfd   :  { %v457_v54 = vadd.f32 %v456_v53, %v313_v50  ;;  %1110 = vmatpush.msra.mxu0 %v1032_v42  ;;  %v1018_v50 = vld [vmem:[#allocation8 + $0x60] sm:$0xff]  ;;  %v1035_v53 = vld [vmem:[#allocation8 + $0xe8] sm:$0xff]  ;;  %v1096_v42 = vld [vmem:[#allocation8 + $0x2d0] sm:$0xff] }
  0xfe   :  { %948 = vmatpush.msrb.mxu1 %v643_v46  ;;  %v1026_v46 = vld [vmem:[#allocation8 + $0xa0] sm:$0xff] }
  0xff   :  { %1111 = vmatpush.msra.mxu0 %v1030_v43  ;;  %v1097_v43 = vld [vmem:[#allocation8 + $0x2d8] sm:$0xff] }
 0x100   :  { %949 = vmatpush.msrb.mxu1 %v640_v47  ;;  %v476_v56 = vpop.f32.mrf.mxu3  ;;  %v1024_v47 = vld [vmem:[#allocation8 + $0x90] sm:$0xff] }
 0x101   :  { %v477_v58 = vadd.f32 %v476_v56, %v457_v54  ;;  %1112 = vmatpush.msra.mxu0 %v1028_v45  ;;  %v1064_v54 = vld [vmem:[#allocation8 + $0x1d0] sm:$0xff]  ;;  %v1033_v56 = vld [vmem:[#allocation8 + $0xd8] sm:$0xff] }
 0x102   :  { %950 = vmatpush.msrb.mxu1 %v637_v48  ;;  %v1022_v48 = vld [vmem:[#allocation8 + $0x80] sm:$0xff]  ;;  %v1041_v45 = vld [vmem:[#allocation8 + $0x118] sm:$0xff] }
 0x103   :  { %1113 = vmatpush.msra.mxu0 %v1026_v46  ;;  %v1094_v46 = vld [vmem:[#allocation8 + $0x2c0] sm:$0xff] }
 0x104   :  { %951 = vmatpush.msrb.mxu1 %v634_v44  ;;  %v1020_v44 = vld [vmem:[#allocation8 + $0x70] sm:$0xff] }
 0x105   :  { %1114 = vmatpush.msra.mxu0 %v1024_v47  ;;  %v1095_v47 = vld [vmem:[#allocation8 + $0x2c8] sm:$0xff] }
 0x106   :  { %952 = vmatpush.msrb.mxu1 %v631_v49  ;;  %v1068_v49 = vld [vmem:[#allocation8 + $0x1f0] sm:$0xff] }
 0x107   :  { %1115 = vmatpush.msra.mxu0 %v1022_v48  ;;  %v1039_v48 = vld [vmem:[#allocation8 + $0x108] sm:$0xff] }
 0x108   :  { %953 = vmatpush.msrb.mxu1 %v628_v51  ;;  %v1037_v51 = vld [vmem:[#allocation8 + $0xf8] sm:$0xff] }
 0x109   :  { %1116 = vmatpush.msra.mxu0 %v1020_v44  ;;  %v1092_v44 = vld [vmem:[#allocation8 + $0x2b0] sm:$0xff] }
 0x10a   :  { %954 = vmatpush.msrb.mxu1 %v625_v52  ;;  %v1066_v52 = vld [vmem:[#allocation8 + $0x1e0] sm:$0xff] }
 0x10b   :  { %v496_v59 = vpop.f32.mrf.mxu0  ;;  %1117 = vmatpush.msra.mxu0 %v1018_v50  ;;  %v1090_v50 = vld [vmem:[#allocation8 + $0x2a0] sm:$0xff] }
 0x10c   :  { %955 = vmatpush.msrb.mxu1 %v622_v55  ;;  %v497_v61 = vadd.f32 %v496_v59, %v477_v58  ;;  %v556_v11 = vpop.f32.mrf.mxu3  ;;  %v1016_v55 = vld [vmem:[#allocation8 + $0x50] sm:$0xff]  ;;  %v1014_v58 = vld [vmem:[#allocation8 + $0x40] sm:$0xff]  ;;  %v1031_v59 = vld [vmem:[#allocation8 + $0xc8] sm:$0xff] }
 0x10d   :  { %1118 = vmatpush.msra.mxu0 %v1016_v55  ;;  %v1864_v55 = vld [vmem:[#allocation11 + $0x4] sm:$0x7] }
 0x10e   :  { %956 = vmatpush.msrb.mxu1 %v619_v57  ;;  %v1858_v1 = vmax.f32 %v497_v61, 0.0  ;;  %v1062_v57 = vld [vmem:[#allocation8 + $0x1c0] sm:$0xff]  ;;  %v1012_v61 = vld [vmem:[#allocation8 + $0x30] sm:$0xff] }
 0x10f   :  { %v516_v4 = vpop.f32.mrf.mxu1  ;;  %1119 = vmatpush.msra.mxu0 %v1014_v58  ;;  %v1085_v58 = vld [vmem:[#allocation8 + $0x278] sm:$0xff] }
 0x110   :  { %957 = vmatpush.msrb.mxu1 %v616_v60  ;;  %v517_v5 = vadd.f32 %v516_v4, %v314_v63  ;;  %819 = vmatmul.f32.vlgmr.msrb.gmra.mxu2 %v1858_v1  ;;  %v1060_v60 = vld [vmem:[#allocation8 + $0x1b0] sm:$0xff]  ;;  %v1029_v63 = vld [vmem:[#allocation8 + $0xb8] sm:$0xff] }
 0x111   :  { %963 = vmatpush.msrb.mxu2 %v706_v2  ;;  %v1027_v2 = vld [vmem:[#allocation8 + $0xa8] sm:$0xff]  ;;  %1120 = vmatpush.msra.mxu0 %v1012_v61  ;;  %v1056_v4 = vld [vmem:[#allocation8 + $0x190] sm:$0xff] }
 0x112   :  { %958 = vmatpush.msrb.mxu1 %v613_v0  ;;  %v536_v7 = vpop.f32.mrf.mxu2  ;;  %v1058_v0 = vld [vmem:[#allocation8 + $0x1a0] sm:$0xff]  ;;  %v1083_v61 = vld [vmem:[#allocation8 + $0x268] sm:$0xff] }
 0x113   :  { %959 = vmatmul.f32.vlgmr.msrb.gmra.mxu1 %v1851_v32  ;;  %v537_v10 = vadd.f32 %v536_v7, %v517_v5  ;;  %964 = vmatpush.msrb.mxu2 %v703_v6  ;;  %v664_v32 = vld [vmem:[#allocation7 + $0x328] sm:$0xff]  ;;  %v1008_v5 = vld [vmem:[#allocation8 + $0x10] sm:$0xff]  ;;  %v1025_v6 = vld [vmem:[#allocation8 + $0x98] sm:$0xff] }
 0x114   :  { %1128 = vmatpush.msra.mxu1 %v1068_v49  ;;  %v1006_v7 = vld [vmem:[#allocation8] sm:$0xff]  ;;  %v1093_v49 = vld [vmem:[#allocation8 + $0x2b8] sm:$0xff] }
 0x115   :  { %v557_v12 = vadd.f32 %v556_v11, %v537_v10  ;;  %965 = vmatpush.msrb.mxu2 %v700_v9  ;;  %v1069_v9 = vld [vmem:[#allocation8 + $0x1f8] sm:$0xff]  ;;  %v1067_v10 = vld [vmem:[#allocation8 + $0x1e8] sm:$0xff] }
 0x116   :  { %1129 = vmatpush.msra.mxu1 %v1066_v52  ;;  %v1065_v11 = vld [vmem:[#allocation8 + $0x1d8] sm:$0xff]  ;;  %v1088_v52 = vld [vmem:[#allocation8 + $0x290] sm:$0xff] }
 0x117   :  { %v562_v14 = vmax.f32 %v557_v12, 0.0  ;;  %966 = vmatpush.msrb.mxu2 %v697_v17  ;;  %v1054_v17 = vld [vmem:[#allocation8 + $0x180] sm:$0xff]  ;;  %v1023_v12 = vld [vmem:[#allocation8 + $0x88] sm:$0xff] }
 0x118   :  { %899 = vmatmul.f32.vlgmr.msra.gmra.mxu2 %v1858_v1  ;;  %1130 = vmatpush.msra.mxu1 %v1064_v54  ;;  %v1086_v54 = vld [vmem:[#allocation8 + $0x280] sm:$0xff] }
 0x119   :  { %839 = vmatmul.f32.vlgmr.msrb.gmra.mxu3 %v562_v14  ;;  %967 = vmatpush.msrb.mxu2 %v694_v13  ;;  %v1063_v13 = vld [vmem:[#allocation8 + $0x1c8] sm:$0xff] }
 0x11a   :  { %983 = vmatpush.msrb.mxu3 %v754_v15  ;;  %1131 = vmatpush.msra.mxu1 %v1062_v57  ;;  %v1021_v15 = vld [vmem:[#allocation8 + $0x78] sm:$0xff]  ;;  %v1084_v57 = vld [vmem:[#allocation8 + $0x270] sm:$0xff] }
 0x11b   :  { %968 = vmatpush.msrb.mxu2 %v691_v16  ;;  %v1061_v16 = vld [vmem:[#allocation8 + $0x1b8] sm:$0xff] }
 0x11c   :  { %984 = vmatpush.msrb.mxu3 %v751_v8  ;;  %1132 = vmatpush.msra.mxu1 %v1060_v60  ;;  %v1050_v8 = vld [vmem:[#allocation8 + $0x160] sm:$0xff] }
 0x11d   :  { %969 = vmatpush.msrb.mxu2 %v688_v18  ;;  %v1019_v18 = vld [vmem:[#allocation8 + $0x68] sm:$0xff]  ;;  %v1082_v60 = vld [vmem:[#allocation8 + $0x260] sm:$0xff] }
 0x11e   :  { %985 = vmatpush.msrb.mxu3 %v748_v19  ;;  %1133 = vmatpush.msra.mxu1 %v1058_v0  ;;  %v1059_v19 = vld [vmem:[#allocation8 + $0x1a8] sm:$0xff] }
 0x11f   :  { %970 = vmatpush.msrb.mxu2 %v685_v62  ;;  %v1048_v62 = vld [vmem:[#allocation8 + $0x150] sm:$0xff] }
 0x120   :  { %986 = vmatpush.msrb.mxu3 %v745_v20  ;;  %1134 = vmatpush.msra.mxu1 %v1056_v4  ;;  %v1017_v20 = vld [vmem:[#allocation8 + $0x58] sm:$0xff] }
 0x121   :  { %919 = vmatmul.f32.vlgmr.msra.gmra.mxu3 %v562_v14  ;;  %971 = vmatpush.msrb.mxu2 %v682_v3  ;;  %v1057_v3 = vld [vmem:[#allocation8 + $0x198] sm:$0xff] }
 0x122   :  { %987 = vmatpush.msrb.mxu3 %v742_v21  ;;  %1135 = vmatpush.msra.mxu1 %v1054_v17  ;;  %v1046_v21 = vld [vmem:[#allocation8 + $0x140] sm:$0xff]  ;;  %v758_v17 = vperm.slane %v1864_v55, 1 }
 0x123   :  { %972 = vmatpush.msrb.mxu2 %v679_v22  ;;  %v1015_v22 = vld [vmem:[#allocation8 + $0x48] sm:$0xff] }
 0x124   :  { %988 = vmatpush.msrb.mxu3 %v739_v23  ;;  %v1055_v23 = vld [vmem:[#allocation8 + $0x188] sm:$0xff] }
 0x125   :  { %973 = vmatpush.msrb.mxu2 %v676_v24  ;;  %v1044_v24 = vld [vmem:[#allocation8 + $0x130] sm:$0xff] }
 0x126   :  { %989 = vmatpush.msrb.mxu3 %v736_v25  ;;  %v1013_v25 = vld [vmem:[#allocation8 + $0x38] sm:$0xff] }
 0x127   :  { %974 = vmatpush.msrb.mxu2 %v673_v26  ;;  %v1053_v26 = vld [vmem:[#allocation8 + $0x178] sm:$0xff] }
 0x128   :  { %990 = vmatpush.msrb.mxu3 %v733_v27  ;;  %v1042_v27 = vld [vmem:[#allocation8 + $0x120] sm:$0xff] }
 0x129   :  { %975 = vmatpush.msrb.mxu2 %v670_v28  ;;  %v1011_v28 = vld [vmem:[#allocation8 + $0x28] sm:$0xff] }
 0x12a   :  { %991 = vmatpush.msrb.mxu3 %v730_v29  ;;  %v1051_v29 = vld [vmem:[#allocation8 + $0x168] sm:$0xff] }
 0x12b   :  { %976 = vmatpush.msrb.mxu2 %v667_v30  ;;  %v1040_v30 = vld [vmem:[#allocation8 + $0x110] sm:$0xff] }
 0x12c   :  { %992 = vmatpush.msrb.mxu3 %v727_v31  ;;  %v1009_v31 = vld [vmem:[#allocation8 + $0x18] sm:$0xff] }
 0x12d   :  { %977 = vmatpush.msrb.mxu2 %v664_v32  ;;  %v1049_v32 = vld [vmem:[#allocation8 + $0x158] sm:$0xff] }
 0x12e   :  { %993 = vmatpush.msrb.mxu3 %v724_v33  ;;  %v1038_v33 = vld [vmem:[#allocation8 + $0x100] sm:$0xff] }
 0x12f   :  { %978 = vmatpush.msrb.mxu2 %v661_v34  ;;  %v1007_v34 = vld [vmem:[#allocation8 + $0x8] sm:$0xff] }
 0x130   :  { %994 = vmatpush.msrb.mxu3 %v721_v35  ;;  %979 = vmatmul.f32.vlgmr.msrb.gmra.mxu2 %v1858_v1  ;;  %v1010_v1 = vld [vmem:[#allocation8 + $0x20] sm:$0xff]  ;;  %v1047_v35 = vld [vmem:[#allocation8 + $0x148] sm:$0xff] }
 0x131   :  { %1121 = vmatpush.msra.mxu0 %v1010_v1  ;;  %v1080_v1 = vld [vmem:[#allocation8 + $0x250] sm:$0xff] }
 0x132   :  { %995 = vmatpush.msrb.mxu3 %v718_v36  ;;  %v1100_v36 = vld [vmem:[#allocation8 + $0x2f0] sm:$0xff] }
 0x133   :  { %1122 = vmatpush.msra.mxu0 %v1008_v5  ;;  %1148 = vmatpush.msra.mxu2 %v1100_v36  ;;  %v1078_v5 = vld [vmem:[#allocation8 + $0x240] sm:$0xff] }
 0x134   :  { %996 = vmatpush.msrb.mxu3 %v715_v37  ;;  %v1101_v37 = vld [vmem:[#allocation8 + $0x2f8] sm:$0xff] }
 0x135   :  { %1123 = vmatpush.msra.mxu0 %v1006_v7  ;;  %v1079_v7 = vld [vmem:[#allocation8 + $0x248] sm:$0xff] }
 0x136   :  { %997 = vmatpush.msrb.mxu3 %v712_v39  ;;  %v1098_v39 = vld [vmem:[#allocation8 + $0x2e0] sm:$0xff] }
 0x137   :  { %1188 = vmatpush.msrb.mxu0 %v1069_v9  ;;  %1149 = vmatpush.msra.mxu2 %v1098_v39  ;;  %v1076_v9 = vld [vmem:[#allocation8 + $0x230] sm:$0xff] }
 0x138   :  { %998 = vmatpush.msrb.mxu3 %v709_v40  ;;  %v1099_v40 = vld [vmem:[#allocation8 + $0x2e8] sm:$0xff]  ;;  %v1292_v39 = vld [vmem:[#allocation8 + $0x4f0] sm:$0xff] }
 0x139   :  { %999 = vmatmul.f32.vlgmr.msrb.gmra.mxu3 %v562_v14  ;;  %1189 = vmatpush.msrb.mxu0 %v1067_v10  ;;  %v1052_v14 = vld [vmem:[#allocation8 + $0x170] sm:$0xff]  ;;  %v1077_v10 = vld [vmem:[#allocation8 + $0x238] sm:$0xff] }
 0x13a   :  { %1168 = vmatpush.msra.mxu3 %v1037_v51  ;;  %1136 = vmatpush.msra.mxu1 %v1052_v14  ;;  %v1091_v51 = vld [vmem:[#allocation8 + $0x2a8] sm:$0xff] }
 0x13b   :  { %1190 = vmatpush.msrb.mxu0 %v1065_v11  ;;  %1150 = vmatpush.msra.mxu2 %v1096_v42  ;;  %v1075_v14 = vld [vmem:[#allocation8 + $0x228] sm:$0xff] }
 0x13c   :  { %1169 = vmatpush.msra.mxu3 %v1035_v53  ;;  %1137 = vmatpush.msra.mxu1 %v1050_v8  ;;  %v1089_v53 = vld [vmem:[#allocation8 + $0x298] sm:$0xff]  ;;  %v1072_v8 = vld [vmem:[#allocation8 + $0x210] sm:$0xff]  ;;  %v1291_v42 = vld [vmem:[#allocation8 + $0x4e8] sm:$0xff] }
 0x13d   :  { %1191 = vmatpush.msrb.mxu0 %v1063_v13  ;;  %1151 = vmatpush.msra.mxu2 %v1094_v46  ;;  %v1074_v13 = vld [vmem:[#allocation8 + $0x220] sm:$0xff]  ;;  %v1260_v46 = vld [vmem:[#allocation8 + $0x3f0] sm:$0xff] }
 0x13e   :  { %1170 = vmatpush.msra.mxu3 %v1033_v56  ;;  %1138 = vmatpush.msra.mxu1 %v1048_v62  ;;  %v1087_v56 = vld [vmem:[#allocation8 + $0x288] sm:$0xff] }
 0x13f   :  { %1192 = vmatpush.msrb.mxu0 %v1061_v16  ;;  %1152 = vmatpush.msra.mxu2 %v1092_v44  ;;  %v1287_v44 = vld [vmem:[#allocation8 + $0x4c8] sm:$0xff] }
 0x140   :  { %1171 = vmatpush.msra.mxu3 %v1031_v59  ;;  %1139 = vmatpush.msra.mxu1 %v1046_v21  ;;  %v757_v59 = vperm.slane %v1864_v55, 0  ;;  %v1070_v21 = vld [vmem:[#allocation8 + $0x200] sm:$0xff] }
 0x141   :  { %1193 = vmatpush.msrb.mxu0 %v1059_v19  ;;  %1153 = vmatpush.msra.mxu2 %v1090_v50  ;;  %v1284_v50 = vld [vmem:[#allocation8 + $0x4b0] sm:$0xff] }
 0x142   :  { %1172 = vmatpush.msra.mxu3 %v1029_v63  ;;  %1140 = vmatpush.msra.mxu1 %v1044_v24 }
 0x143   :  { %1194 = vmatpush.msrb.mxu0 %v1057_v3  ;;  %1154 = vmatpush.msra.mxu2 %v1088_v52  ;;  %v1285_v52 = vld [vmem:[#allocation8 + $0x4b8] sm:$0xff] }
 0x144   :  { %1173 = vmatpush.msra.mxu3 %v1027_v2  ;;  %1141 = vmatpush.msra.mxu1 %v1042_v27  ;;  %v1081_v2 = vld [vmem:[#allocation8 + $0x258] sm:$0xff] }
 0x145   :  { %1195 = vmatpush.msrb.mxu0 %v1055_v23  ;;  %1155 = vmatpush.msra.mxu2 %v1086_v54  ;;  %v1282_v54 = vld [vmem:[#allocation8 + $0x4a0] sm:$0xff] }
 0x146   :  { %1174 = vmatpush.msra.mxu3 %v1025_v6  ;;  %1142 = vmatpush.msra.mxu1 %v1040_v30 }
 0x147   :  { %1196 = vmatpush.msrb.mxu0 %v1053_v26  ;;  %1156 = vmatpush.msra.mxu2 %v1084_v57  ;;  %v1254_v57 = vld [vmem:[#allocation8 + $0x3c0] sm:$0xff] }
 0x148   :  { %1175 = vmatpush.msra.mxu3 %v1023_v12  ;;  %1143 = vmatpush.msra.mxu1 %v1038_v33 }
 0x149   :  { %1197 = vmatpush.msrb.mxu0 %v1051_v29  ;;  %1157 = vmatpush.msra.mxu2 %v1082_v60  ;;  %v759_v29 = vperm.slane %v1864_v55, 2  ;;  %v1257_v55 = vld [vmem:[#allocation8 + $0x3d8] sm:$0xff] }
 0x14a   :  { %1176 = vmatpush.msra.mxu3 %v1021_v15  ;;  %1208 = vmatpush.msrb.mxu1 %v1101_v37  ;;  %v1281_v60 = vld [vmem:[#allocation8 + $0x498] sm:$0xff] }
 0x14b   :  { %1198 = vmatpush.msrb.mxu0 %v1049_v32  ;;  %1158 = vmatpush.msra.mxu2 %v1080_v1  ;;  %v1279_v1 = vld [vmem:[#allocation8 + $0x488] sm:$0xff] }
 0x14c   :  { %1177 = vmatpush.msra.mxu3 %v1019_v18  ;;  %1209 = vmatpush.msrb.mxu1 %v1099_v40  ;;  %v1073_v18 = vld [vmem:[#allocation8 + $0x218] sm:$0xff] }
 0x14d   :  { %1199 = vmatpush.msrb.mxu0 %v1047_v35  ;;  %1159 = vmatpush.msra.mxu2 %v1078_v5  ;;  %v1293_v40 = vld [vmem:[#allocation8 + $0x4f8] sm:$0xff]  ;;  %v1276_v5 = vld [vmem:[#allocation8 + $0x470] sm:$0xff] }
 0x14e   :  { %1178 = vmatpush.msra.mxu3 %v1017_v20  ;;  %1210 = vmatpush.msrb.mxu1 %v1097_v43  ;;  %v1288_v43 = vld [vmem:[#allocation8 + $0x4d0] sm:$0xff] }
 0x14f   :  { %1200 = vmatpush.msrb.mxu0 %v1045_v38  ;;  %1160 = vmatpush.msra.mxu2 %v1076_v9  ;;  %v1249_v9 = vld [vmem:[#allocation8 + $0x398] sm:$0xff] }
 0x150   :  { %1179 = vmatpush.msra.mxu3 %v1015_v22  ;;  %1211 = vmatpush.msrb.mxu1 %v1095_v47  ;;  %v1071_v22 = vld [vmem:[#allocation8 + $0x208] sm:$0xff]  ;;  %v1286_v47 = vld [vmem:[#allocation8 + $0x4c0] sm:$0xff] }
 0x151   :  { %1201 = vmatpush.msrb.mxu0 %v1043_v41  ;;  %1161 = vmatpush.msra.mxu2 %v1074_v13  ;;  %v1290_v41 = vld [vmem:[#allocation8 + $0x4e0] sm:$0xff]  ;;  %v1272_v13 = vld [vmem:[#allocation8 + $0x450] sm:$0xff] }
 0x152   :  { %1180 = vmatpush.msra.mxu3 %v1013_v25  ;;  %1212 = vmatpush.msrb.mxu1 %v1093_v49  ;;  %v1258_v49 = vld [vmem:[#allocation8 + $0x3e0] sm:$0xff] }
 0x153   :  { %1202 = vmatpush.msrb.mxu0 %v1041_v45  ;;  %v780_v63 = vpop.f32.mrf.mxu0  ;;  %1162 = vmatpush.msra.mxu2 %v1072_v8  ;;  %v1289_v45 = vld [vmem:[#allocation8 + $0x4d8] sm:$0xff]  ;;  %v1270_v8 = vld [vmem:[#allocation8 + $0x440] sm:$0xff] }
 0x154   :  { %1181 = vmatpush.msra.mxu3 %v1011_v28  ;;  %1213 = vmatpush.msrb.mxu1 %v1091_v51  ;;  %v781_v4 = vadd.f32 %v780_v63, %v757_v59  ;;  %v1259_v51 = vld [vmem:[#allocation8 + $0x3e8] sm:$0xff]  ;;  %v1280_v59 = vld [vmem:[#allocation8 + $0x490] sm:$0xff]  ;;  %v1253_v63 = vld [vmem:[#allocation8 + $0x3b8] sm:$0xff] }
 0x155   :  { %1203 = vmatpush.msrb.mxu0 %v1039_v48  ;;  %1163 = vmatpush.msra.mxu2 %v1070_v21  ;;  %v1261_v48 = vld [vmem:[#allocation8 + $0x3f8] sm:$0xff]  ;;  %v1240_v21 = vld [vmem:[#allocation8 + $0x350] sm:$0xff] }
 0x156   :  { %1182 = vmatpush.msra.mxu3 %v1009_v31  ;;  %1214 = vmatpush.msrb.mxu1 %v1089_v53  ;;  %v1256_v53 = vld [vmem:[#allocation8 + $0x3d0] sm:$0xff] }
 0x157   :  { %1300 = vmatpush.msrb.mxu2 %v1260_v46  ;;  %v1410_v46 = vld [vmem:[#allocation10 + $0xe0] sm:$0xff] }
 0x158   :  { %1183 = vmatpush.msra.mxu3 %v1007_v34  ;;  %1215 = vmatpush.msrb.mxu1 %v1087_v56  ;;  %v1283_v56 = vld [vmem:[#allocation8 + $0x4a8] sm:$0xff] }
 0x159   :  { %1301 = vmatpush.msrb.mxu2 %v1258_v49  ;;  %v1393_v49 = vld [vmem:[#allocation10 + $0x58] sm:$0xff] }
 0x15a   :  { %1216 = vmatpush.msrb.mxu1 %v1085_v58  ;;  %1320 = vmatpush.msrb.mxu3 %v1292_v39  ;;  %v1255_v58 = vld [vmem:[#allocation8 + $0x3c8] sm:$0xff]  ;;  %v1413_v39 = vld [vmem:[#allocation10 + $0xf8] sm:$0xff] }
 0x15b   :  { %v860_v19 = vpop.f32.mrf.mxu0  ;;  %1302 = vmatpush.msrb.mxu2 %v1256_v53  ;;  %v1102_v53 = vld [vmem:[#allocation11 + $0x7] sm:$0x3] }
 0x15c   :  { %1217 = vmatpush.msrb.mxu1 %v1083_v61  ;;  %v861_v20 = vadd.f32 %v860_v19, %v758_v17  ;;  %1321 = vmatpush.msrb.mxu3 %v1290_v41  ;;  %v1252_v61 = vld [vmem:[#allocation8 + $0x3b0] sm:$0xff]  ;;  %v1246_v17 = vld [vmem:[#allocation8 + $0x380] sm:$0xff]  ;;  %v1397_v41 = vld [vmem:[#allocation10 + $0x78] sm:$0xff] }
 0x15d   :  { %1303 = vmatpush.msrb.mxu2 %v1254_v57  ;;  %v1242_v19 = vld [vmem:[#allocation8 + $0x360] sm:$0xff] }
 0x15e   :  { %1218 = vmatpush.msrb.mxu1 %v1081_v2  ;;  %1322 = vmatpush.msrb.mxu3 %v1288_v43  ;;  %v1250_v2 = vld [vmem:[#allocation8 + $0x3a0] sm:$0xff]  ;;  %v1411_v43 = vld [vmem:[#allocation10 + $0xe8] sm:$0xff] }
 0x15f   :  { %1304 = vmatpush.msrb.mxu2 %v1252_v61  ;;  %v1104_v61 = vperm.slane %v1102_v53, 0 }
 0x160   :  { %1219 = vmatpush.msrb.mxu1 %v1079_v7  ;;  %1323 = vmatpush.msrb.mxu3 %v1286_v47  ;;  %v1248_v7 = vld [vmem:[#allocation8 + $0x390] sm:$0xff]  ;;  %v1394_v47 = vld [vmem:[#allocation10 + $0x60] sm:$0xff] }
 0x161   :  { %1305 = vmatpush.msrb.mxu2 %v1250_v2 }
 0x162   :  { %1220 = vmatpush.msrb.mxu1 %v1077_v10  ;;  %1324 = vmatpush.msrb.mxu3 %v1284_v50  ;;  %v1274_v10 = vld [vmem:[#allocation8 + $0x460] sm:$0xff]  ;;  %v1408_v50 = vld [vmem:[#allocation10 + $0xd0] sm:$0xff] }
 0x163   :  { %1306 = vmatpush.msrb.mxu2 %v1248_v7 }
 0x164   :  { %1221 = vmatpush.msrb.mxu1 %v1075_v14  ;;  %1325 = vmatpush.msrb.mxu3 %v1282_v54  ;;  %v1273_v14 = vld [vmem:[#allocation8 + $0x458] sm:$0xff]  ;;  %v1105_v54 = vperm.slane %v1102_v53, 1 }
 0x165   :  { %1307 = vmatpush.msrb.mxu2 %v1246_v17  ;;  %v1390_v17 = vld [vmem:[#allocation10 + $0x40] sm:$0xff]  ;;  %v1515_v53 = vld [vmem:[#allocation10 + $0x1f8] sm:$0xff] }
 0x166   :  { %1222 = vmatpush.msrb.mxu1 %v1073_v18  ;;  %1326 = vmatpush.msrb.mxu3 %v1280_v59  ;;  %v1271_v18 = vld [vmem:[#allocation8 + $0x448] sm:$0xff] }
 0x168   :  { %1223 = vmatpush.msrb.mxu1 %v1071_v22  ;;  %v1266_v22 = vld [vmem:[#allocation8 + $0x420] sm:$0xff] }
 0x170   :  { %v800_v0 = vpop.f32.mrf.mxu1 }
 0x171   :  { %v801_v11 = vadd.f32 %v800_v0, %v781_v4  ;;  %v1278_v0 = vld [vmem:[#allocation8 + $0x480] sm:$0xff]  ;;  %v1251_v4 = vld [vmem:[#allocation8 + $0x3a8] sm:$0xff] }
 0x172   :  { %1327 = vmatpush.msrb.mxu3 %v1278_v0 }
 0x173   :  { %v940_v30 = vpop.f32.mrf.mxu0 }
 0x174   :  { %v941_v32 = vadd.f32 %v940_v30, %v759_v29  ;;  %1328 = vmatpush.msrb.mxu3 %v1276_v5  ;;  %v1236_v29 = vld [vmem:[#allocation8 + $0x330] sm:$0xff]  ;;  %v1262_v30 = vld [vmem:[#allocation8 + $0x400] sm:$0xff] }
 0x176   :  { %1329 = vmatpush.msrb.mxu3 %v1274_v10  ;;  %v1391_v10 = vld [vmem:[#allocation10 + $0x48] sm:$0xff] }
 0x178   :  { %v880_v62 = vpop.f32.mrf.mxu1  ;;  %1330 = vmatpush.msrb.mxu3 %v1272_v13  ;;  %v1389_v13 = vld [vmem:[#allocation10 + $0x38] sm:$0xff] }
 0x179   :  { %v881_v24 = vadd.f32 %v880_v62, %v861_v20  ;;  %v1243_v62 = vld [vmem:[#allocation8 + $0x368] sm:$0xff]  ;;  %v1268_v20 = vld [vmem:[#allocation8 + $0x430] sm:$0xff] }
 0x17a   :  { %1331 = vmatpush.msrb.mxu3 %v1270_v8  ;;  %v1387_v8 = vld [vmem:[#allocation10 + $0x28] sm:$0xff] }
 0x17c   :  { %1332 = vmatpush.msrb.mxu3 %v1268_v20  ;;  %v1385_v20 = vld [vmem:[#allocation10 + $0x18] sm:$0xff] }
 0x17e   :  { %1333 = vmatpush.msrb.mxu3 %v1266_v22  ;;  %v1383_v22 = vld [vmem:[#allocation10 + $0x8] sm:$0xff] }
 0x190   :  { %v960_v31 = vpop.f32.mrf.mxu1 }
 0x191   :  { %v961_v34 = vadd.f32 %v960_v31, %v941_v32  ;;  %v1237_v31 = vld [vmem:[#allocation8 + $0x338] sm:$0xff]  ;;  %v1263_v32 = vld [vmem:[#allocation8 + $0x408] sm:$0xff] }
 0x193   :  { %v820_v6 = vpop.f32.mrf.mxu2 }
 0x194   :  { %v821_v12 = vadd.f32 %v820_v6, %v801_v11  ;;  %v1277_v6 = vld [vmem:[#allocation8 + $0x478] sm:$0xff]  ;;  %v1275_v11 = vld [vmem:[#allocation8 + $0x468] sm:$0xff] }
 0x19b   :  { %v900_v23 = vpop.f32.mrf.mxu2 }
 0x19c   :  { %v840_v15 = vpop.f32.mrf.mxu3  ;;  %v901_v25 = vadd.f32 %v900_v23, %v881_v24  ;;  %v1241_v23 = vld [vmem:[#allocation8 + $0x358] sm:$0xff]  ;;  %v1267_v24 = vld [vmem:[#allocation8 + $0x428] sm:$0xff] }
 0x19d   :  { %v841_v16 = vadd.f32 %v840_v15, %v821_v12  ;;  %v1247_v12 = vld [vmem:[#allocation8 + $0x388] sm:$0xff]  ;;  %v1244_v15 = vld [vmem:[#allocation8 + $0x370] sm:$0xff] }
 0x19e   :  { %1308 = vmatpush.msrb.mxu2 %v1244_v15  ;;  %v1388_v15 = vld [vmem:[#allocation10 + $0x30] sm:$0xff] }
 0x19f   :  { %v1003_v3 = vmax.f32 %v841_v16, 0.0  ;;  %v1245_v16 = vld [vmem:[#allocation8 + $0x378] sm:$0xff] }
 0x1a0   :  { %1309 = vmatpush.msrb.mxu2 %v1242_v19  ;;  %v1386_v19 = vld [vmem:[#allocation10 + $0x20] sm:$0xff] }
 0x1a1   :  { %1124 = vmatmul.f32.vlgmr.msra.gmra.mxu0 %v1003_v3  ;;  %1184 = vmatmul.f32.vlgmr.msra.gmra.mxu3 %v1003_v3  ;;  %v1269_v3 = vld [vmem:[#allocation8 + $0x438] sm:$0xff] }
 0x1a2   :  { %1340 = vmatpush.msra.mxu0 %v1261_v48  ;;  %1310 = vmatpush.msrb.mxu2 %v1240_v21  ;;  %v1409_v48 = vld [vmem:[#allocation10 + $0xd8] sm:$0xff]  ;;  %v1384_v21 = vld [vmem:[#allocation10 + $0x10] sm:$0xff] }
 0x1a4   :  { %v920_v26 = vpop.f32.mrf.mxu3  ;;  %1341 = vmatpush.msra.mxu0 %v1259_v51  ;;  %v1392_v51 = vld [vmem:[#allocation10 + $0x50] sm:$0xff] }
 0x1a5   :  { %v921_v27 = vadd.f32 %v920_v26, %v901_v25  ;;  %v1238_v25 = vld [vmem:[#allocation8 + $0x340] sm:$0xff]  ;;  %v1264_v26 = vld [vmem:[#allocation8 + $0x410] sm:$0xff] }
 0x1a6   :  { %1342 = vmatpush.msra.mxu0 %v1257_v55  ;;  %1311 = vmatpush.msrb.mxu2 %v1238_v25  ;;  %v1406_v55 = vld [vmem:[#allocation10 + $0xc0] sm:$0xff]  ;;  %v1473_v25 = vld [vmem:[#allocation10 + $0x170] sm:$0xff] }
 0x1a7   :  { %v1004_v28 = vmax.f32 %v921_v27, 0.0  ;;  %v1239_v27 = vld [vmem:[#allocation8 + $0x348] sm:$0xff]  ;;  %1334 = vmatpush.msrb.mxu3 %v1264_v26 }
 0x1a8   :  { %1343 = vmatpush.msra.mxu0 %v1255_v58  ;;  %1312 = vmatpush.msrb.mxu2 %v1236_v29  ;;  %v1405_v58 = vld [vmem:[#allocation10 + $0xb8] sm:$0xff]  ;;  %v1472_v26 = vld [vmem:[#allocation10 + $0x168] sm:$0xff]  ;;  %v1469_v29 = vld [vmem:[#allocation10 + $0x150] sm:$0xff] }
 0x1a9   :  { %1144 = vmatmul.f32.vlgmr.msra.gmra.mxu1 %v1004_v28  ;;  %1204 = vmatmul.f32.vlgmr.msrb.gmra.mxu0 %v1004_v28  ;;  %v1265_v28 = vld [vmem:[#allocation8 + $0x418] sm:$0xff] }
 0x1aa   :  { %1360 = vmatpush.msra.mxu1 %v1293_v40  ;;  %1344 = vmatpush.msra.mxu0 %v1253_v63  ;;  %v1412_v40 = vld [vmem:[#allocation10 + $0xf0] sm:$0xff] }
 0x1ab   :  { %1335 = vmatpush.msrb.mxu3 %v1262_v30  ;;  %v1468_v30 = vld [vmem:[#allocation10 + $0x148] sm:$0xff] }
 0x1ac   :  { %1361 = vmatpush.msra.mxu1 %v1291_v42  ;;  %1345 = vmatpush.msra.mxu0 %v1251_v4  ;;  %v1396_v42 = vld [vmem:[#allocation10 + $0x70] sm:$0xff] }
 0x1ad   :  { %1438 = vmatpush.msra.mxu3 %v1413_v39 }
 0x1ae   :  { %1362 = vmatpush.msra.mxu1 %v1289_v45  ;;  %1346 = vmatpush.msra.mxu0 %v1249_v9  ;;  %v1395_v45 = vld [vmem:[#allocation10 + $0x68] sm:$0xff] }
 0x1af   :  { %1439 = vmatpush.msra.mxu3 %v1412_v40 }
 0x1b0   :  { %1363 = vmatpush.msra.mxu1 %v1287_v44  ;;  %1347 = vmatpush.msra.mxu0 %v1247_v12  ;;  %v1403_v12 = vld [vmem:[#allocation10 + $0xa8] sm:$0xff] }
 0x1b1   :  { %1440 = vmatpush.msra.mxu3 %v1411_v43 }
 0x1b2   :  { %1364 = vmatpush.msra.mxu1 %v1285_v52  ;;  %1348 = vmatpush.msra.mxu0 %v1245_v16  ;;  %v1407_v52 = vld [vmem:[#allocation10 + $0xc8] sm:$0xff]  ;;  %v1401_v16 = vld [vmem:[#allocation10 + $0x98] sm:$0xff] }
 0x1b3   :  { %v980_v33 = vpop.f32.mrf.mxu2  ;;  %1441 = vmatpush.msra.mxu3 %v1410_v46 }
 0x1b4   :  { %v981_v35 = vadd.f32 %v980_v33, %v961_v34  ;;  %1365 = vmatpush.msra.mxu1 %v1283_v56  ;;  %1349 = vmatpush.msra.mxu0 %v1243_v62  ;;  %v1234_v33 = vld [vmem:[#allocation8 + $0x320] sm:$0xff]  ;;  %v1235_v34 = vld [vmem:[#allocation8 + $0x328] sm:$0xff] }
 0x1b5   :  { %1313 = vmatpush.msrb.mxu2 %v1234_v33  ;;  %1442 = vmatpush.msra.mxu3 %v1409_v48  ;;  %v1399_v62 = vld [vmem:[#allocation10 + $0x88] sm:$0xff]  ;;  %v1466_v33 = vld [vmem:[#allocation10 + $0x138] sm:$0xff] }
 0x1b6   :  { %1366 = vmatpush.msra.mxu1 %v1281_v60  ;;  %1350 = vmatpush.msra.mxu0 %v1241_v23  ;;  %v1382_v23 = vld [vmem:[#allocation10] sm:$0xff]  ;;  %v1464_v48 = vld [vmem:[#allocation10 + $0x128] sm:$0xff] }
 0x1b7   :  { %1443 = vmatpush.msra.mxu3 %v1408_v50  ;;  %v1461_v50 = vld [vmem:[#allocation10 + $0x110] sm:$0xff] }
 0x1b8   :  { %1367 = vmatpush.msra.mxu1 %v1279_v1  ;;  %1351 = vmatpush.msra.mxu0 %v1239_v27  ;;  %v1471_v27 = vld [vmem:[#allocation10 + $0x160] sm:$0xff] }
 0x1b9   :  { %1444 = vmatpush.msra.mxu3 %v1407_v52  ;;  %v1459_v52 = vld [vmem:[#allocation10 + $0x100] sm:$0xff] }
 0x1ba   :  { %1368 = vmatpush.msra.mxu1 %v1277_v6  ;;  %1352 = vmatpush.msra.mxu0 %v1237_v31  ;;  %v1467_v31 = vld [vmem:[#allocation10 + $0x140] sm:$0xff] }
 0x1bb   :  { %1445 = vmatpush.msra.mxu3 %v1406_v55  ;;  %v1513_v55 = vld [vmem:[#allocation10 + $0x1e8] sm:$0xff] }
 0x1bc   :  { %v1000_v36 = vpop.f32.mrf.mxu3  ;;  %1369 = vmatpush.msra.mxu1 %v1275_v11  ;;  %1353 = vmatpush.msra.mxu0 %v1235_v34  ;;  %v1404_v11 = vld [vmem:[#allocation10 + $0xb0] sm:$0xff] }
 0x1bd   :  { %v1001_v37 = vadd.f32 %v1000_v36, %v981_v35  ;;  %v1232_v35 = vld [vmem:[#allocation8 + $0x310] sm:$0xff]  ;;  %v1233_v36 = vld [vmem:[#allocation8 + $0x318] sm:$0xff]  ;;  %1446 = vmatpush.msra.mxu3 %v1405_v58 }
 0x1be   :  { %1370 = vmatpush.msra.mxu1 %v1273_v14  ;;  %1314 = vmatpush.msrb.mxu2 %v1232_v35  ;;  %v1402_v14 = vld [vmem:[#allocation10 + $0xa0] sm:$0xff]  ;;  %v1510_v58 = vld [vmem:[#allocation10 + $0x1d0] sm:$0xff] }
 0x1bf   :  { %v1005_v38 = vmax.f32 %v1001_v37, 0.0  ;;  %1354 = vmatpush.msra.mxu0 %v1233_v36  ;;  %v1230_v37 = vld [vmem:[#allocation8 + $0x300] sm:$0xff]  ;;  %1447 = vmatpush.msra.mxu3 %v1404_v11  ;;  %v1502_v11 = vld [vmem:[#allocation10 + $0x190] sm:$0xff] }
 0x1c0   :  { %1371 = vmatpush.msra.mxu1 %v1271_v18  ;;  %1315 = vmatpush.msrb.mxu2 %v1230_v37  ;;  %v1400_v18 = vld [vmem:[#allocation10 + $0x90] sm:$0xff] }
 0x1c1   :  { %1164 = vmatmul.f32.vlgmr.msra.gmra.mxu2 %v1005_v38  ;;  %1224 = vmatmul.f32.vlgmr.msrb.gmra.mxu1 %v1005_v38  ;;  %v1231_v38 = vld [vmem:[#allocation8 + $0x308] sm:$0xff] }
 0x1c2   :  { %1372 = vmatpush.msra.mxu1 %v1269_v3  ;;  %1355 = vmatpush.msra.mxu0 %v1231_v38  ;;  %v1398_v3 = vld [vmem:[#allocation10 + $0x80] sm:$0xff] }
 0x1c3   :  { %1418 = vmatpush.msra.mxu2 %v1397_v41  ;;  %1448 = vmatpush.msra.mxu3 %v1403_v12  ;;  %v1500_v12 = vld [vmem:[#allocation10 + $0x180] sm:$0xff] }
 0x1c4   :  { %1373 = vmatpush.msra.mxu1 %v1267_v24  ;;  %v1474_v24 = vld [vmem:[#allocation10 + $0x178] sm:$0xff] }
 0x1c5   :  { %1419 = vmatpush.msra.mxu2 %v1396_v42  ;;  %1449 = vmatpush.msra.mxu3 %v1402_v14 }
 0x1c6   :  { %1374 = vmatpush.msra.mxu1 %v1265_v28  ;;  %1479 = vmatpush.msrb.mxu0 %v1474_v24  ;;  %v1470_v28 = vld [vmem:[#allocation10 + $0x158] sm:$0xff] }
 0x1c7   :  { %1420 = vmatpush.msra.mxu2 %v1395_v45  ;;  %1450 = vmatpush.msra.mxu3 %v1401_v16 }
 0x1c8   :  { %1375 = vmatpush.msra.mxu1 %v1263_v32  ;;  %1480 = vmatpush.msrb.mxu0 %v1473_v25  ;;  %v1294_v32 = vld [vmem:[#allocation11 + $0x9] sm:$0x3] }
 0x1c9   :  { %1421 = vmatpush.msra.mxu2 %v1394_v47  ;;  %1451 = vmatpush.msra.mxu3 %v1400_v18  ;;  %v1297_v34 = vperm.slane %v1294_v32, 1  ;;  %v1296_v39 = vperm.slane %v1294_v32, 0  ;;  %v1465_v47 = vld [vmem:[#allocation10 + $0x130] sm:$0xff] }
 0x1ca   :  { %1481 = vmatpush.msrb.mxu0 %v1472_v26  ;;  %1520 = vmatpush.msrb.mxu1 %v1515_v53 }
 0x1cb   :  { %1422 = vmatpush.msra.mxu2 %v1393_v49  ;;  %1452 = vmatpush.msra.mxu3 %v1399_v62  ;;  %v1462_v49 = vld [vmem:[#allocation10 + $0x118] sm:$0xff] }
 0x1cc   :  { %1482 = vmatpush.msrb.mxu0 %v1471_v27 }
 0x1cd   :  { %1423 = vmatpush.msra.mxu2 %v1392_v51  ;;  %1453 = vmatpush.msra.mxu3 %v1398_v3  ;;  %v1460_v51 = vld [vmem:[#allocation10 + $0x108] sm:$0xff] }
 0x1ce   :  { %1483 = vmatpush.msrb.mxu0 %v1470_v28 }
 0x1cf   :  { %1424 = vmatpush.msra.mxu2 %v1391_v10 }
 0x1d0   :  { %1484 = vmatpush.msrb.mxu0 %v1469_v29 }
 0x1d1   :  { %1425 = vmatpush.msra.mxu2 %v1390_v17  ;;  %v1501_v17 = vld [vmem:[#allocation10 + $0x188] sm:$0xff] }
 0x1d2   :  { %1485 = vmatpush.msrb.mxu0 %v1468_v30 }
 0x1d3   :  { %1426 = vmatpush.msra.mxu2 %v1389_v13  ;;  %v1577_v13 = vld [vmem:[#allocation11 + $0xc] ss:$0 sm:$0xff] }
 0x1d4   :  { %1486 = vmatpush.msrb.mxu0 %v1467_v31 }
 0x1d5   :  { %1427 = vmatpush.msra.mxu2 %v1388_v15 }
 0x1d6   :  { %1487 = vmatpush.msrb.mxu0 %v1466_v33 }
 0x1d7   :  { %1428 = vmatpush.msra.mxu2 %v1387_v8  ;;  %v1578_v8 = vld [vmem:[#allocation11 + $0xd] ss:$0 sm:$0xff] }
 0x1d8   :  { %1488 = vmatpush.msrb.mxu0 %v1465_v47 }
 0x1d9   :  { %1429 = vmatpush.msra.mxu2 %v1386_v19 }
 0x1da   :  { %1489 = vmatpush.msrb.mxu0 %v1464_v48 }
 0x1db   :  { %1430 = vmatpush.msra.mxu2 %v1385_v20 }
 0x1dd   :  { %1431 = vmatpush.msra.mxu2 %v1384_v21 }
 0x1df   :  { %1432 = vmatpush.msra.mxu2 %v1383_v22 }
 0x1e1   :  { %1433 = vmatpush.msra.mxu2 %v1382_v23 }
 0x21e   :  { %v1125_v44 = vpop.f32.mrf.mxu0 }
 0x21f   :  { %v1126_v2 = vadd.f32 %v1125_v44, %v1104_v61  ;;  %v1463_v44 = vld [vmem:[#allocation10 + $0x120] sm:$0xff]  ;;  %v1507_v61 = vld [vmem:[#allocation10 + $0x1b8] sm:$0xff] }
 0x220   :  { %1490 = vmatpush.msrb.mxu0 %v1463_v44 }
 0x222   :  { %1491 = vmatpush.msrb.mxu0 %v1462_v49 }
 0x224   :  { %v1185_v56 = vpop.f32.mrf.mxu3  ;;  %1492 = vmatpush.msrb.mxu0 %v1461_v50 }
 0x225   :  { %v1186_v59 = vadd.f32 %v1185_v56, %v1105_v54  ;;  %v1514_v54 = vld [vmem:[#allocation10 + $0x1f0] sm:$0xff]  ;;  %v1512_v56 = vld [vmem:[#allocation10 + $0x1e0] sm:$0xff] }
 0x226   :  { %v1145_v57 = vpop.f32.mrf.mxu1  ;;  %v1205_v60 = vpop.f32.mrf.mxu0  ;;  %1493 = vmatpush.msrb.mxu0 %v1460_v51  ;;  %1521 = vmatpush.msrb.mxu1 %v1514_v54 }
 0x227   :  { %v1206_v63 = vadd.f32 %v1205_v60, %v1186_v59  ;;  %v1146_v5 = vadd.f32 %v1145_v57, %v1126_v2  ;;  %v1511_v57 = vld [vmem:[#allocation10 + $0x1d8] sm:$0xff]  ;;  %v1509_v59 = vld [vmem:[#allocation10 + $0x1c8] sm:$0xff]  ;;  %v1508_v60 = vld [vmem:[#allocation10 + $0x1c0] sm:$0xff] }
 0x228   :  { %1494 = vmatpush.msrb.mxu0 %v1459_v52  ;;  %1522 = vmatpush.msrb.mxu1 %v1513_v55  ;;  %v1576_v2 = vld [vmem:[#allocation11 + $0xb] ss:$0 sm:$0xff] }
 0x22a   :  { %1523 = vmatpush.msrb.mxu1 %v1512_v56 }
 0x22c   :  { %1524 = vmatpush.msrb.mxu1 %v1511_v57 }
 0x22e   :  { %1525 = vmatpush.msrb.mxu1 %v1510_v58 }
 0x230   :  { %1526 = vmatpush.msrb.mxu1 %v1509_v59 }
 0x232   :  { %1527 = vmatpush.msrb.mxu1 %v1508_v60 }
 0x234   :  { %1528 = vmatpush.msrb.mxu1 %v1507_v61 }
 0x23e   :  { %v1225_v0 = vpop.f32.mrf.mxu1 }
 0x23f   :  { %v1226_v1 = vadd.f32 %v1225_v0, %v1206_v63  ;;  %v1506_v63 = vld [vmem:[#allocation10 + $0x1b0] sm:$0xff]  ;;  %v1505_v0 = vld [vmem:[#allocation10 + $0x1a8] sm:$0xff] }
 0x240   :  { %1529 = vmatpush.msrb.mxu1 %v1506_v63 }
 0x241   :  { %v1229_v4 = vmax.f32 %v1226_v1, 0.0  ;;  %v1504_v1 = vld [vmem:[#allocation10 + $0x1a0] sm:$0xff] }
 0x242   :  { %1530 = vmatpush.msrb.mxu1 %v1505_v0 }
 0x243   :  { %1336 = vmatmul.f32.vlgmr.msrb.gmra.mxu3 %v1229_v4  ;;  %1376 = vmatmul.f32.vlgmr.msra.gmra.mxu1 %v1229_v4  ;;  %v1503_v4 = vld [vmem:[#allocation10 + $0x198] sm:$0xff] }
 0x244   :  { %v1165_v6 = vpop.f32.mrf.mxu2  ;;  %1531 = vmatpush.msrb.mxu1 %v1504_v1 }
 0x245   :  { %v1166_v7 = vadd.f32 %v1165_v6, %v1146_v5 }
 0x246   :  { %1532 = vmatpush.msrb.mxu1 %v1503_v4 }
 0x247   :  { %v1228_v9 = vmax.f32 %v1166_v7, 0.0 }
 0x248   :  { %1533 = vmatpush.msrb.mxu1 %v1502_v11 }
 0x249   :  { %1316 = vmatmul.f32.vlgmr.msrb.gmra.mxu2 %v1228_v9  ;;  %1356 = vmatmul.f32.vlgmr.msra.gmra.mxu0 %v1228_v9 }
 0x24a   :  { %1534 = vmatpush.msrb.mxu1 %v1501_v17 }
 0x24c   :  { %1535 = vmatpush.msrb.mxu1 %v1500_v12 }
 0x2c0   :  { %v1377_v37 = vpop.f32.mrf.mxu1 }
 0x2c6   :  { %v1357_v35 = vpop.f32.mrf.mxu0  ;;  %v1337_v43 = vpop.f32.mrf.mxu3 }
 0x2c7   :  { %v1358_v36 = vadd.f32 %v1357_v35, %v1297_v34 }
 0x2c9   :  { %v1378_v38 = vadd.f32 %v1377_v37, %v1358_v36 }
 0x2cb   :  { %v1381_v40 = vmax.f32 %v1378_v38, 0.0 }
 0x2cc   :  { %v1317_v41 = vpop.f32.mrf.mxu2 }
 0x2cd   :  { %v1318_v42 = vadd.f32 %v1317_v41, %v1296_v39  ;;  %1454 = vmatmul.f32.vlgmr.msra.gmra.mxu3 %v1381_v40 }
 0x2cf   :  { %v1338_v45 = vadd.f32 %v1337_v43, %v1318_v42 }
 0x2d1   :  { %v1380_v46 = vmax.f32 %v1338_v45, 0.0 }
 0x2d3   :  { %1434 = vmatmul.f32.vlgmr.msra.gmra.mxu2 %v1380_v46 }
 0x350   :  { %v1455_v7 = vpop.f32.mrf.mxu3 }
 0x356   :  { %v1435_v5 = vpop.f32.mrf.mxu2 }
 0x357   :  { %v1436_v6 = vadd.f32 %v1576_v2, %v1435_v5 }
 0x359   :  { %v1456_v9 = vadd.f32 %v1455_v7, %v1436_v6 }
 0x35b   :  { %v1458_v10 = vmax.f32 %v1456_v9, 0.0 }
 0x35d   :  { %1495 = vmatmul.f32.vlgmr.msrb.gmra.mxu0 %v1458_v10 }
 0x3da   :  { %v1496_v14 = vpop.f32.mrf.mxu0 }
 0x3db   :  { %v1497_v15 = vadd.f32 %v1577_v13, %v1496_v14 }
 0x3dd   :  { %v1499_v16 = vmax.f32 %v1497_v15, 0.0 }
 0x3df   :  { %1536 = vmatmul.f32.vlgmr.msrb.gmra.mxu1 %v1499_v16 }
 0x45c   :  { %v1537_v18 = vpop.f32.mrf.mxu1 }
 0x45d   :  { %v1538_v19 = vadd.f32 %v1578_v8, %v1537_v18 }
 0x45f   :  { %1540 = vst [vmem:[#allocation13] sm:$0xff] %v1538_v19 }
 0x460   :  { %1551 = dma.vmem_to_hbm [thread:$0]  %s1547_s5, 128, %s1549_s9, [#allocation4]  }
 0x461   :  { %1755 = dma.done.wait [#allocation4], 128  }
 0x462   :  { %1756 = vsyncadd [#allocation4], 4294967168 }
 0x463   :  { %1556 = vsyncpa [#allocation3], 1 }
 0x464   :  { %1557 = vsyncpa [#allocation6], 1 }
 0x465   :  { %1558 = vsyncpa [#allocation9], 1 }
 0x466   :  { %1559 = vsyncpa [#allocation12], 1 }
 0x467   :  { %1560 = vsyncpa [#allocation4], 1 }

</bundles_post_ra>
